<compile_context>
chip_gen: v7x
topology: tpu7x:2x2x1
jax: 0.10.0
libtpu: 0.0.40
codegen_flags: <defaults>
</compile_context>

<pallas_src>
import math

import jax
import jax.numpy as jnp
from jax import lax
from jax.experimental import pallas as pl
from jax.experimental.pallas import tpu as pltpu

_EPS = 1e-5
GROUP = 8   # time steps per scan group (L is padded to a multiple of this)


# ----------------------------- in-kernel helpers -----------------------------
def _silu_exact(x):
    return x * (1.0 / (1.0 + jnp.exp(-x)))


def _silu_fast(x):
    # gate-only SiLU: approximate reciprocal runs on the EUP (cheap slot)
    return x * pl.reciprocal(1.0 + jnp.exp(-x), approx=True)


def _softplus_stable(x):
    return jnp.maximum(x, 0.0) + jnp.log(1.0 + jnp.exp(-jnp.abs(x)))


def _layernorm(x, w, b):
    m = jnp.mean(x, axis=-1, keepdims=True)
    xm = x - m
    v = jnp.mean(xm * xm, axis=-1, keepdims=True)
    return xm * lax.rsqrt(v + _EPS) * w + b


# ------------------------------- fused kernel --------------------------------
def _pvm_kernel(x_ref,                                    # (1, L, C) activations
                lnw_ref, lnb_ref,                         # (1, C) LayerNorm affine
                inw_ref,                                  # (C, 8di) bf16 fused in_proj
                convw_ref, convb_ref,                     # (d_conv, 4di), (1, 4di)
                dbcw_ref, dtb_ref,                        # (4di, 8S+4di) bf16, (1, 4di)
                nA_ref,                                   # (S, 4di)  = -exp(A_log).T tiled
                d_ref,                                    # (1, 4di) D tiled
                outw_ref,                                 # (4di, C) bf16 block-diag
                projw_ref, projb_ref,                     # (C, O) bf16, (1, O)
                rep_ref, msel_ref, spread_ref, rept_ref,  # 0/1 expansion constants
                skip_ref,                                 # (1, 1) in SMEM
                o_ref,                                    # (1, L, O)
                xn_s, z_s, xc_s, dbc_s, y_s):             # VMEM scratch
    L = x_ref.shape[1]
    di4 = convb_ref.shape[1]
    S = nA_ref.shape[0]
    S4 = 4 * S
    S8 = 8 * S
    d_conv = convw_ref.shape[0]
    G = rep_ref.shape[1]
    PAD = 8                                               # 8-aligned causal zero pad

    x = x_ref[0]                                          # (L, C)

    # ---- LayerNorm 1 --------------------------------------------------------
    xn = _layernorm(x, lnw_ref[...], lnb_ref[...])        # (L, C)
    xn_s[...] = xn

    # ---- fused in_proj (x | z branches), bf16 operands / f32 accumulation ---
    xz = jnp.dot(xn.astype(jnp.bfloat16), inw_ref[...],
                 preferred_element_type=jnp.float32)      # (L, 8di)
    z_s[...] = xz[:, di4:]

    # ---- causal depthwise conv on values (no pad-scratch round trip) --------
    xi = xz[:, :di4]                                      # (L, 4di)
    xpad = jnp.concatenate(
        [jnp.zeros((PAD, di4), jnp.float32), xi], axis=0)  # (L+8, 4di), aligned pieces
    acc = jnp.zeros((L, di4), jnp.float32) + convb_ref[...]
    for k in range(d_conv):
        s = d_conv - 1 - k
        acc = acc + xpad[PAD - s:PAD - s + L, :] * convw_ref[k:k + 1, :]
    xc = _silu_exact(acc)                                 # (L, 4di)
    xc_s[...] = xc

    # ---- fused B | C | dt projection (one lane-dense matmul + store) --------
    dbc = jnp.dot(xc.astype(jnp.bfloat16), dbcw_ref[...],
                  preferred_element_type=jnp.float32)     # (L, 8S + 4di)
    dbc_s[:, 0:S8] = dbc[:, 0:S8]                         # raw B | C (128-lane aligned)
    dbc_s[:, S8:] = _softplus_stable(dbc[:, S8:] + dtb_ref[...])   # softplus(dt)

    nA = nA_ref[...]                                      # (S, 4di)
    rep = rep_ref[...]                                    # (G*S, G)
    msel = msel_ref[...]                                  # (G*S, 4S)
    spread = spread_ref[...]                              # (4S, 4di)
    rept = rept_ref[...]                                  # (G, G*S)

    # ---- selective scan: ONE merged (S, 4di) state, groups of G steps -------
    def group_body(g, h):
        t0 = pl.multiple_of(g * G, G)
        blk = dbc_s[pl.ds(t0, G), :]                      # (G, 8S+4di)
        b_blk = blk[:, 0:S4]                              # (G, 4S)
        c_blk = blk[:, S4:S8]                             # (G, 4S)
        dt_blk = blk[:, S8:]                              # (G, 4di)
        dtx_blk = dt_blk * xc_s[pl.ds(t0, G), :]          # (G, 4di)

        # expand B / C from (G, 4S) [chunk-major states] to (G*S, 4di)
        # [state on sublanes x channel on lanes] with two tiny 0/1 matmuls.
        b_exp = jnp.dot(jnp.dot(rep, b_blk) * msel, spread,
                        preferred_element_type=jnp.float32)      # (G*S, 4di)
        c_exp = jnp.dot(jnp.dot(rep, c_blk) * msel, spread,
                        preferred_element_type=jnp.float32)      # (G*S, 4di)

        # everything independent of h is precomputed -> off the serial chain
        dA = [jnp.exp(nA * dt_blk[u:u + 1, :]) for u in range(G)]            # (S,4di)
        inp = [b_exp[u * S:(u + 1) * S, :] * dtx_blk[u:u + 1, :]
               for u in range(G)]                                             # (S,4di)

        prods = []
        for u in range(G):                                # static unroll over time
            h = h * dA[u] + inp[u]                        # (S, 4di) : 2 VPU ops
            prods.append(c_exp[u * S:(u + 1) * S, :] * h)
        prod_all = jnp.concatenate(prods, axis=0)         # (G*S, 4di), aligned pieces
        # segmented sum over the S states of each step with one tiny matmul
        y_s[pl.ds(t0, G), :] = jnp.dot(rept, prod_all,
                                       preferred_element_type=jnp.float32)
        return h

    lax.fori_loop(0, L // G, group_body, jnp.zeros((S, di4), jnp.float32))

    # ---- gate, out_proj (bf16 MXU), skip, LayerNorm 2, final projection -----
    yv = (y_s[...] + xc_s[...] * d_ref[...]) * _silu_fast(z_s[...])     # (L, 4di)
    out_m = jnp.dot(yv.astype(jnp.bfloat16), outw_ref[...],
                    preferred_element_type=jnp.float32)                 # (L, C)
    xm2 = out_m + skip_ref[0, 0] * xn_s[...]                            # mamba + skip

    xn2 = _layernorm(xm2, lnw_ref[...], lnb_ref[...])
    o = jnp.dot(xn2.astype(jnp.bfloat16), projw_ref[...],
                preferred_element_type=jnp.float32) + projb_ref[...]
    o_ref[0] = o


# ------------------------------ wrapper / specs -------------------------------
def _fullspec(a):
    nd = a.ndim
    return pl.BlockSpec(a.shape, lambda b, nd=nd: (0,) * nd)


def pvm_layer_pallas(x, kp):
    B, C, H, W = x.shape
    assert C % 4 == 0
    L = H * W
    Lp = ((L + GROUP - 1) // GROUP) * GROUP               # pad so the group size is 8
    O = kp['proj_w'].shape[1]
    di4 = kp['conv_b'].shape[1]
    S = kp['neg_A_T'].shape[0]
    S8 = 8 * S

    x = x.astype(jnp.float32)
    xf = jnp.transpose(x.reshape(B, C, L), (0, 2, 1))     # (B, L, C) token-major
    if Lp != L:
        xf = jnp.pad(xf, ((0, 0), (0, Lp - L), (0, 0)))

    weight_args = [kp['ln_w'], kp['ln_b'], kp['in_w'],
                   kp['conv_w'], kp['conv_b'],
                   kp['dbc_w'], kp['dt_b'], kp['neg_A_T'], kp['d4'],
                   kp['out_w'], kp['proj_w'], kp['proj_b'],
                   kp['rep'], kp['msel'], kp['spread'], kp['rept']]

    # scoped-VMEM budget: explicit scratch + double-buffered x/out blocks + weights
    scratch_bytes = 4 * Lp * (C + 3 * di4 + (S8 + di4))
    io_bytes = 2 * 4 * Lp * (C + O)
    w_bytes = 2 * sum(int(a.size) * a.dtype.itemsize for a in weight_args)
    vmem_limit = int(min(100 * 1024 * 1024,
                         max(32 * 1024 * 1024,
                             2 * (scratch_bytes + io_bytes + w_bytes) + (4 << 20))))

    out = pl.pallas_call(
        _pvm_kernel,
        out_shape=jax.ShapeDtypeStruct((B, Lp, O), jnp.float32),
        grid=(B,),
        in_specs=([pl.BlockSpec((1, Lp, C), lambda b: (b, 0, 0))]
                  + [_fullspec(a) for a in weight_args]
                  + [pl.BlockSpec(memory_space=pltpu.MemorySpace.SMEM)]),
        out_specs=pl.BlockSpec((1, Lp, O), lambda b: (b, 0, 0)),
        scratch_shapes=[
            pltpu.VMEM((Lp, C), jnp.float32),             # xn (needed for skip)
            pltpu.VMEM((Lp, di4), jnp.float32),           # z gate
            pltpu.VMEM((Lp, di4), jnp.float32),           # xc (post conv + silu)
            pltpu.VMEM((Lp, S8 + di4), jnp.float32),      # [B | C | softplus(dt)]
            pltpu.VMEM((Lp, di4), jnp.float32),           # scan output y
        ],
        compiler_params=pltpu.CompilerParams(
            dimension_semantics=("parallel",),
            vmem_limit_bytes=vmem_limit),
    )(xf, *weight_args, kp['skip'])

    out = out[:, :L, :]
    return jnp.transpose(out, (0, 2, 1)).reshape(B, O, H, W)


# --------------------------- parameter preparation ---------------------------
def init_params(key, input_dim, output_dim, d_state=16, d_conv=4, expand=2):
    d_model = input_dim // 4
    d_inner = expand * d_model
    dt_rank = math.ceil(d_model / 16)
    ks = jax.random.split(key, 12)

    def n(k, shape, scale=0.3):
        return scale * jax.random.normal(k, shape, jnp.float32)

    return {
        'ln_w': 1.0 + 0.1 * jax.random.normal(ks[0], (1, input_dim), jnp.float32),
        'ln_b': 0.1 * jax.random.normal(ks[1], (1, input_dim), jnp.float32),
        'in_w_t': n(ks[2], (d_model, 2 * d_inner)),
        'conv_w_t': n(ks[3], (d_conv, d_inner)),
        'conv_b': 0.1 * jax.random.normal(ks[4], (1, d_inner), jnp.float32),
        'xproj_w_t': n(ks[5], (d_inner, dt_rank + 2 * d_state)),
        'dt_w_t': n(ks[6], (dt_rank, d_inner)),
        'dt_b': 0.1 * jax.random.normal(ks[7], (1, d_inner), jnp.float32),
        'A_logT': jnp.log(jnp.tile(
            jnp.arange(1, d_state + 1, dtype=jnp.float32)[:, None],
            (1, d_inner))),                                   # (d_state, d_inner)
        'D': jnp.ones((1, d_inner), jnp.float32),
        'out_w_t': n(ks[8], (d_inner, d_model)),
        'skip': jnp.ones((1, 1), jnp.float32),
        'proj_w_t': n(ks[9], (input_dim, output_dim)),
        'proj_b': 0.1 * jax.random.normal(ks[10], (1, output_dim), jnp.float32),
    }


def prepare_kernel_params(p):
    """Pre-arrange shared Mamba weights as fused block-diagonal / tiled arrays."""
    d_conv, d_inner = p['conv_w_t'].shape
    d_state = p['A_logT'].shape[0]
    dt_rank = p['dt_w_t'].shape[0]

    def block_diag4(w):
        k, n_ = w.shape
        out = jnp.zeros((4 * k, 4 * n_), w.dtype)
        for c in range(4):
            out = out.at[c * k:(c + 1) * k, c * n_:(c + 1) * n_].set(w)
        return out

    in_w = p['in_w_t']
    w_dt_comb = p['xproj_w_t'][:, :dt_rank] @ p['dt_w_t']          # fold dt_proj
    b_part = p['xproj_w_t'][:, dt_rank:dt_rank + d_state]
    c_part = p['xproj_w_t'][:, dt_rank + d_state:dt_rank + 2 * d_state]

    # fused in_proj: [x branch | z branch]
    in_w_fused = jnp.concatenate(
        [block_diag4(in_w[:, :d_inner]), block_diag4(in_w[:, d_inner:])], axis=1)
    # fused x_proj: [B | C | dt]  (B|C occupy the first 8*d_state = 128 lanes)
    dbc_w = jnp.concatenate(
        [block_diag4(b_part), block_diag4(c_part), block_diag4(w_dt_comb)], axis=1)

    # 0/1 expansion constants for the merged-state scan (group size GROUP)
    S, di, G = d_state, d_inner, GROUP
    r = jnp.arange(G * S)
    rep = (r[:, None] // S == jnp.arange(G)[None, :]).astype(jnp.float32)
    msel = (r[:, None] % S == (jnp.arange(4 * S)[None, :] % S)).astype(jnp.float32)
    spread = (jnp.arange(4 * S)[:, None] // S
              == (jnp.arange(4 * di)[None, :] // di)).astype(jnp.float32)
    rept = (jnp.arange(G)[:, None] == (r[None, :] // S)).astype(jnp.float32)

    return {
        'ln_w': p['ln_w'], 'ln_b': p['ln_b'],
        'in_w': in_w_fused.astype(jnp.bfloat16),
        'conv_w': jnp.tile(p['conv_w_t'], (1, 4)),
        'conv_b': jnp.tile(p['conv_b'], (1, 4)),
        'dbc_w': dbc_w.astype(jnp.bfloat16),
        'dt_b': jnp.tile(p['dt_b'], (1, 4)),
        'neg_A_T': -jnp.exp(jnp.tile(p['A_logT'], (1, 4))),        # (S, 4*d_inner)
        'd4': jnp.tile(p['D'], (1, 4)),
        'out_w': block_diag4(p['out_w_t']).astype(jnp.bfloat16),
        'proj_w': p['proj_w_t'].astype(jnp.bfloat16),
        'proj_b': p['proj_b'],
        'rep': rep, 'msel': msel, 'spread': spread, 'rept': rept,
        'skip': p['skip'].reshape(1, 1),
    }


# ------------------------------ pure-JAX reference ---------------------------
def _layernorm_ref(x, w, b):
    m = jnp.mean(x, axis=-1, keepdims=True)
    xm = x - m
    v = jnp.mean(xm * xm, axis=-1, keepdims=True)
    return xm * lax.rsqrt(v + _EPS) * w + b


def _mamba_ref(xch, p):
    d_conv, d_inner = p['conv_w_t'].shape
    d_state = p['A_logT'].shape[0]
    dt_rank = p['dt_w_t'].shape[0]
    L = xch.shape[1]
    hp = jax.lax.Precision.HIGHEST

    xz = jnp.einsum('nld,de->nle', xch, p['in_w_t'], precision=hp)
    xi, z = xz[..., :d_inner], xz[..., d_inner:]
    xpad = jnp.pad(xi, ((0, 0), (d_conv - 1, 0), (0, 0)))
    acc = jnp.zeros_like(xi) + p['conv_b']
    for k in range(d_conv):
        acc = acc + xpad[:, k:k + L, :] * p['conv_w_t'][k]
    xc = jax.nn.silu(acc)

    x_dbl = jnp.einsum('nld,de->nle', xc, p['xproj_w_t'], precision=hp)
    dt_in = x_dbl[..., :dt_rank]
    Bm = x_dbl[..., dt_rank:dt_rank + d_state]
    Cm = x_dbl[..., dt_rank + d_state:dt_rank + 2 * d_state]
    dt = jax.nn.softplus(
        jnp.einsum('nlr,rd->nld', dt_in, p['dt_w_t'], precision=hp) + p['dt_b'])
    A = -jnp.exp(p['A_logT'].T)                                    # (d_inner, d_state)

    def step(h, xs):
        dt_t, b_t, c_t, x_t = xs
        dA = jnp.exp(dt_t[:, None] * A)
        h = h * dA + dt_t[:, None] * b_t[None, :] * x_t[:, None]
        return h, jnp.sum(h * c_t[None, :], axis=-1)

    def seq(dt_sq, b_sq, c_sq, x_sq):
        h0 = jnp.zeros((d_inner, d_state), jnp.float32)
        _, ys = lax.scan(step, h0, (dt_sq, b_sq, c_sq, x_sq))
        return ys

    y = jax.vmap(seq)(dt, Bm, Cm, xc)
    y = y + xc * p['D']
    y = y * jax.nn.silu(z)
    return jnp.einsum('nld,de->nle', y, p['out_w_t'], precision=hp)


def pvm_ref(x, p):
    B, C, H, W = x.shape
    L = H * W
    d = C // 4
    x = x.astype(jnp.float32)
    xf = jnp.transpose(x.reshape(B, C, L), (0, 2, 1))
    xn = _layernorm_ref(xf, p['ln_w'], p['ln_b'])
    outs = []
    for c in range(4):
        xc_ = xn[:, :, c * d:(c + 1) * d]
        outs.append(_mamba_ref(xc_, p) + p['skip'] * xc_)
    xm = jnp.concatenate(outs, axis=-1)
    xm = _layernorm_ref(xm, p['ln_w'], p['ln_b'])
    y = jnp.einsum('nlc,co->nlo', xm, p['proj_w_t'],
                   precision=jax.lax.Precision.HIGHEST) + p['proj_b']
    out_dim = p['proj_w_t'].shape[1]
    return jnp.transpose(y, (0, 2, 1)).reshape(B, out_dim, H, W)


if __name__ == "__main__":
    B, input_dim, H, W = 2, 16, 8, 8
    output_dim = 16

    key = jax.random.PRNGKey(0)
    k_p, k_x = jax.random.split(key)
    params = init_params(k_p, input_dim, output_dim)
    kparams = prepare_kernel_params(params)
    x = jax.random.normal(k_x, (B, input_dim, H, W), jnp.float32)

    out = jax.block_until_ready(pvm_layer_pallas(x, kparams))
    ref = pvm_ref(x, params)

    assert out.shape == (B, output_dim, H, W), out.shape
    assert bool(jnp.all(jnp.isfinite(out)))
    # bf16 operands on all five fused projections (per perf feedback) widen the numeric
    # envelope vs. the all-f32 reference; 5e-2 still cleanly separates a correct kernel
    # from any structural error (wrong conv shift / B-C expansion / scan would be O(1)).
    max_err = float(jnp.max(jnp.abs(out - ref)))
    assert bool(jnp.allclose(out, ref, rtol=5e-2, atol=5e-2)), max_err

    print("KERNEL_OK")
</pallas_src>

<mosaic_0001>
module attributes {stable_mosaic.version = 11 : i64} {
  func.func @_pvm_kernel(%arg0: i32, %arg1: memref<1x64x16xf32, #tpu.memory_space<vmem>>, %arg2: memref<1x16xf32, #tpu.memory_space<vmem>>, %arg3: memref<1x16xf32, #tpu.memory_space<vmem>>, %arg4: memref<16x64xbf16, #tpu.memory_space<vmem>>, %arg5: memref<4x32xf32, #tpu.memory_space<vmem>>, %arg6: memref<1x32xf32, #tpu.memory_space<vmem>>, %arg7: memref<32x160xbf16, #tpu.memory_space<vmem>>, %arg8: memref<1x32xf32, #tpu.memory_space<vmem>>, %arg9: memref<16x32xf32, #tpu.memory_space<vmem>>, %arg10: memref<1x32xf32, #tpu.memory_space<vmem>>, %arg11: memref<32x16xbf16, #tpu.memory_space<vmem>>, %arg12: memref<16x16xbf16, #tpu.memory_space<vmem>>, %arg13: memref<1x16xf32, #tpu.memory_space<vmem>>, %arg14: memref<128x8xf32, #tpu.memory_space<vmem>>, %arg15: memref<128x64xf32, #tpu.memory_space<vmem>>, %arg16: memref<64x32xf32, #tpu.memory_space<vmem>>, %arg17: memref<8x128xf32, #tpu.memory_space<vmem>>, %arg18: memref<1x1xf32, #tpu.memory_space<smem>>, %arg19: memref<1x64x16xf32, #tpu.memory_space<vmem>>, %arg20: memref<64x16xf32, #tpu.memory_space<vmem>>, %arg21: memref<64x32xf32, #tpu.memory_space<vmem>>, %arg22: memref<64x32xf32, #tpu.memory_space<vmem>>, %arg23: memref<64x160xf32, #tpu.memory_space<vmem>>, %arg24: memref<64x32xf32, #tpu.memory_space<vmem>>) attributes {dimension_semantics = [#tpu.dimension_semantics<parallel>], iteration_bounds = array<i64: 2>, scalar_prefetch = 0 : i64, scratch_operands = 5 : i64, tpu.core_type = #tpu.core_type<tc>, window_params = [{transform_indices = @transform_0, window_bounds = array<i64: 1, 64, 16>}, {pipeline_mode = #tpu.pipeline_mode<synchronous>, transform_indices = @transform_1, window_bounds = array<i64: 1, 16>}, {pipeline_mode = #tpu.pipeline_mode<synchronous>, transform_indices = @transform_2, window_bounds = array<i64: 1, 16>}, {pipeline_mode = #tpu.pipeline_mode<synchronous>, transform_indices = @transform_3, window_bounds = array<i64: 16, 64>}, {pipeline_mode = #tpu.pipeline_mode<synchronous>, transform_indices = @transform_4, window_bounds = array<i64: 4, 32>}, {pipeline_mode = #tpu.pipeline_mode<synchronous>, transform_indices = @transform_5, window_bounds = array<i64: 1, 32>}, {pipeline_mode = #tpu.pipeline_mode<synchronous>, transform_indices = @transform_6, window_bounds = array<i64: 32, 160>}, {pipeline_mode = #tpu.pipeline_mode<synchronous>, transform_indices = @transform_7, window_bounds = array<i64: 1, 32>}, {pipeline_mode = #tpu.pipeline_mode<synchronous>, transform_indices = @transform_8, window_bounds = array<i64: 16, 32>}, {pipeline_mode = #tpu.pipeline_mode<synchronous>, transform_indices = @transform_9, window_bounds = array<i64: 1, 32>}, {pipeline_mode = #tpu.pipeline_mode<synchronous>, transform_indices = @transform_10, window_bounds = array<i64: 32, 16>}, {pipeline_mode = #tpu.pipeline_mode<synchronous>, transform_indices = @transform_11, window_bounds = array<i64: 16, 16>}, {pipeline_mode = #tpu.pipeline_mode<synchronous>, transform_indices = @transform_12, window_bounds = array<i64: 1, 16>}, {pipeline_mode = #tpu.pipeline_mode<synchronous>, transform_indices = @transform_13, window_bounds = array<i64: 128, 8>}, {pipeline_mode = #tpu.pipeline_mode<synchronous>, transform_indices = @transform_14, window_bounds = array<i64: 128, 64>}, {pipeline_mode = #tpu.pipeline_mode<synchronous>, transform_indices = @transform_15, window_bounds = array<i64: 64, 32>}, {pipeline_mode = #tpu.pipeline_mode<synchronous>, transform_indices = @transform_16, window_bounds = array<i64: 8, 128>}, {transform_indices = @transform_17, window_bounds = array<i64: 1, 1>}, {transform_indices = @transform_18, window_bounds = array<i64: 1, 64, 16>}]} {
    %c0 = arith.constant 0 : index
    %c0_0 = arith.constant 0 : index
    %c0_1 = arith.constant 0 : index
    %0 = vector.load %arg1[%c0, %c0_0, %c0_1] : memref<1x64x16xf32, #tpu.memory_space<vmem>>, vector<1x64x16xf32>
    %1 = vector.shape_cast %0 : vector<1x64x16xf32> to vector<64x16xf32>
    %c0_2 = arith.constant 0 : index
    %c0_3 = arith.constant 0 : index
    %2 = vector.load %arg2[%c0_2, %c0_3] : memref<1x16xf32, #tpu.memory_space<vmem>>, vector<1x16xf32>
    %c0_4 = arith.constant 0 : index
    %c0_5 = arith.constant 0 : index
    %3 = vector.load %arg3[%c0_4, %c0_5] : memref<1x16xf32, #tpu.memory_space<vmem>>, vector<1x16xf32>
    %cst = arith.constant dense<0.000000e+00> : vector<64xf32>
    %4 = vector.multi_reduction <add>, %1, %cst [1] : vector<64x16xf32> to vector<64xf32>
    %5 = vector.shape_cast %4 : vector<64xf32> to vector<64x1xf32>
    %cst_6 = arith.constant 1.600000e+01 : f32
    %6 = vector.broadcast %cst_6 : f32 to vector<64x1xf32>
    %7 = arith.divf %5, %6 : vector<64x1xf32>
    %8 = vector.broadcast %7 : vector<64x1xf32> to vector<64x16xf32>
    %9 = arith.subf %1, %8 : vector<64x16xf32>
    %10 = arith.mulf %9, %9 : vector<64x16xf32>
    %cst_7 = arith.constant dense<0.000000e+00> : vector<64xf32>
    %11 = vector.multi_reduction <add>, %10, %cst_7 [1] : vector<64x16xf32> to vector<64xf32>
    %12 = vector.shape_cast %11 : vector<64xf32> to vector<64x1xf32>
    %cst_8 = arith.constant 1.600000e+01 : f32
    %13 = vector.broadcast %cst_8 : f32 to vector<64x1xf32>
    %14 = arith.divf %12, %13 : vector<64x1xf32>
    %cst_9 = arith.constant 9.99999974E-6 : f32
    %15 = vector.broadcast %cst_9 : f32 to vector<64x1xf32>
    %16 = arith.addf %14, %15 : vector<64x1xf32>
    %17 = math.rsqrt %16 : vector<64x1xf32>
    %18 = vector.broadcast %17 : vector<64x1xf32> to vector<64x16xf32>
    %19 = arith.mulf %9, %18 : vector<64x16xf32>
    %20 = vector.broadcast %2 : vector<1x16xf32> to vector<64x16xf32>
    %21 = arith.mulf %19, %20 : vector<64x16xf32>
    %22 = vector.broadcast %3 : vector<1x16xf32> to vector<64x16xf32>
    %23 = arith.addf %21, %22 : vector<64x16xf32>
    %c0_10 = arith.constant 0 : index
    %c0_11 = arith.constant 0 : index
    %24 = vector.load %arg20[%c0_10, %c0_11] : memref<64x16xf32, #tpu.memory_space<vmem>>, vector<64x16xf32>
    tpu.vector_store %arg20[%c0_10, %c0_11], %23 {strides = array<i32>} : memref<64x16xf32, #tpu.memory_space<vmem>>, vector<64x16xf32>,
    %25 = arith.truncf %23 : vector<64x16xf32> to vector<64x16xbf16>
    %c0_12 = arith.constant 0 : index
    %c0_13 = arith.constant 0 : index
    %26 = vector.load %arg4[%c0_12, %c0_13] : memref<16x64xbf16, #tpu.memory_space<vmem>>, vector<16x64xbf16>
    %cst_14 = arith.constant dense<0.000000e+00> : vector<64x64xf32>
    %27 = tpu.matmul %25, %26, %cst_14 {dimension_numbers = #tpu.dot_dimension_numbers<[1], [0], [0], [1], [0, 0, 1, 1], [], []>} : vector<64x16xbf16>, vector<16x64xbf16>, vector<64x64xf32> -> vector<64x64xf32>
    %28 = vector.extract_strided_slice %27 {offsets = [0, 32], sizes = [64, 32], strides = [1, 1]} : vector<64x64xf32> to vector<64x32xf32>
    %c0_15 = arith.constant 0 : index
    %c0_16 = arith.constant 0 : index
    %29 = vector.load %arg21[%c0_15, %c0_16] : memref<64x32xf32, #tpu.memory_space<vmem>>, vector<64x32xf32>
    tpu.vector_store %arg21[%c0_15, %c0_16], %28 {strides = array<i32>} : memref<64x32xf32, #tpu.memory_space<vmem>>, vector<64x32xf32>,
    %30 = vector.extract_strided_slice %27 {offsets = [0, 0], sizes = [64, 32], strides = [1, 1]} : vector<64x64xf32> to vector<64x32xf32>
    %cst_17 = arith.constant 0.000000e+00 : f32
    %31 = vector.broadcast %cst_17 : f32 to vector<8x32xf32>
    %32 = tpu.concatenate %31, %30 in 0 : vector<8x32xf32>, vector<64x32xf32> -> vector<72x32xf32>
    %cst_18 = arith.constant 0.000000e+00 : f32
    %33 = vector.broadcast %cst_18 : f32 to vector<64x32xf32>
    %c0_19 = arith.constant 0 : index
    %c0_20 = arith.constant 0 : index
    %34 = vector.load %arg6[%c0_19, %c0_20] : memref<1x32xf32, #tpu.memory_space<vmem>>, vector<1x32xf32>
    %35 = vector.broadcast %34 : vector<1x32xf32> to vector<64x32xf32>
    %36 = arith.addf %33, %35 : vector<64x32xf32>
    %37 = vector.extract_strided_slice %32 {offsets = [5, 0], sizes = [64, 32], strides = [1, 1]} : vector<72x32xf32> to vector<64x32xf32>
    %c0_21 = arith.constant 0 : index
    %c0_22 = arith.constant 0 : index
    %38 = vector.load %arg5[%c0_21, %c0_22] : memref<4x32xf32, #tpu.memory_space<vmem>>, vector<1x32xf32>
    %39 = vector.broadcast %38 : vector<1x32xf32> to vector<64x32xf32>
    %40 = arith.mulf %37, %39 : vector<64x32xf32>
    %41 = arith.addf %36, %40 : vector<64x32xf32>
    %42 = vector.extract_strided_slice %32 {offsets = [6, 0], sizes = [64, 32], strides = [1, 1]} : vector<72x32xf32> to vector<64x32xf32>
    %c1 = arith.constant 1 : index
    %c0_23 = arith.constant 0 : index
    %43 = vector.load %arg5[%c1, %c0_23] : memref<4x32xf32, #tpu.memory_space<vmem>>, vector<1x32xf32>
    %44 = vector.broadcast %43 : vector<1x32xf32> to vector<64x32xf32>
    %45 = arith.mulf %42, %44 : vector<64x32xf32>
    %46 = arith.addf %41, %45 : vector<64x32xf32>
    %47 = vector.extract_strided_slice %32 {offsets = [7, 0], sizes = [64, 32], strides = [1, 1]} : vector<72x32xf32> to vector<64x32xf32>
    %c2 = arith.constant 2 : index
    %c0_24 = arith.constant 0 : index
    %48 = vector.load %arg5[%c2, %c0_24] : memref<4x32xf32, #tpu.memory_space<vmem>>, vector<1x32xf32>
    %49 = vector.broadcast %48 : vector<1x32xf32> to vector<64x32xf32>
    %50 = arith.mulf %47, %49 : vector<64x32xf32>
    %51 = arith.addf %46, %50 : vector<64x32xf32>
    %52 = vector.extract_strided_slice %32 {offsets = [8, 0], sizes = [64, 32], strides = [1, 1]} : vector<72x32xf32> to vector<64x32xf32>
    %c3 = arith.constant 3 : index
    %c0_25 = arith.constant 0 : index
    %53 = vector.load %arg5[%c3, %c0_25] : memref<4x32xf32, #tpu.memory_space<vmem>>, vector<1x32xf32>
    %54 = vector.broadcast %53 : vector<1x32xf32> to vector<64x32xf32>
    %55 = arith.mulf %52, %54 : vector<64x32xf32>
    %56 = arith.addf %51, %55 : vector<64x32xf32>
    %cst_26 = arith.constant 0.000000e+00 : f32
    %57 = vector.broadcast %cst_26 : f32 to vector<64x32xf32>
    %58 = arith.subf %57, %56 : vector<64x32xf32>
    %59 = math.exp %58 : vector<64x32xf32>
    %cst_27 = arith.constant 1.000000e+00 : f32
    %60 = vector.broadcast %cst_27 : f32 to vector<64x32xf32>
    %61 = arith.addf %60, %59 : vector<64x32xf32>
    %cst_28 = arith.constant 1.000000e+00 : f32
    %62 = vector.broadcast %cst_28 : f32 to vector<64x32xf32>
    %63 = arith.divf %62, %61 : vector<64x32xf32>
    %64 = arith.mulf %56, %63 : vector<64x32xf32>
    %c0_29 = arith.constant 0 : index
    %c0_30 = arith.constant 0 : index
    %65 = vector.load %arg22[%c0_29, %c0_30] : memref<64x32xf32, #tpu.memory_space<vmem>>, vector<64x32xf32>
    tpu.vector_store %arg22[%c0_29, %c0_30], %64 {strides = array<i32>} : memref<64x32xf32, #tpu.memory_space<vmem>>, vector<64x32xf32>,
    %66 = arith.truncf %64 : vector<64x32xf32> to vector<64x32xbf16>
    %c0_31 = arith.constant 0 : index
    %c0_32 = arith.constant 0 : index
    %67 = vector.load %arg7[%c0_31, %c0_32] : memref<32x160xbf16, #tpu.memory_space<vmem>>, vector<32x160xbf16>
    %cst_33 = arith.constant dense<0.000000e+00> : vector<64x160xf32>
    %68 = tpu.matmul %66, %67, %cst_33 {dimension_numbers = #tpu.dot_dimension_numbers<[1], [0], [0], [1], [0, 0, 1, 1], [], []>} : vector<64x32xbf16>, vector<32x160xbf16>, vector<64x160xf32> -> vector<64x160xf32>
    %69 = vector.extract_strided_slice %68 {offsets = [0, 0], sizes = [64, 128], strides = [1, 1]} : vector<64x160xf32> to vector<64x128xf32>
    %c0_34 = arith.constant 0 : index
    %c0_35 = arith.constant 0 : index
    %70 = vector.load %arg23[%c0_34, %c0_35] : memref<64x160xf32, #tpu.memory_space<vmem>>, vector<64x128xf32>
    tpu.vector_store %arg23[%c0_34, %c0_35], %69 {strides = array<i32>} : memref<64x160xf32, #tpu.memory_space<vmem>>, vector<64x128xf32>,
    %71 = vector.extract_strided_slice %68 {offsets = [0, 128], sizes = [64, 32], strides = [1, 1]} : vector<64x160xf32> to vector<64x32xf32>
    %c0_36 = arith.constant 0 : index
    %c0_37 = arith.constant 0 : index
    %72 = vector.load %arg8[%c0_36, %c0_37] : memref<1x32xf32, #tpu.memory_space<vmem>>, vector<1x32xf32>
    %73 = vector.broadcast %72 : vector<1x32xf32> to vector<64x32xf32>
    %74 = arith.addf %71, %73 : vector<64x32xf32>
    %cst_38 = arith.constant 0.000000e+00 : f32
    %75 = vector.broadcast %cst_38 : f32 to vector<64x32xf32>
    %76 = arith.maximumf %74, %75 : vector<64x32xf32>
    %77 = math.absf %74 : vector<64x32xf32>
    %cst_39 = arith.constant 0.000000e+00 : f32
    %78 = vector.broadcast %cst_39 : f32 to vector<64x32xf32>
    %79 = arith.subf %78, %77 : vector<64x32xf32>
    %80 = math.exp %79 : vector<64x32xf32>
    %cst_40 = arith.constant 1.000000e+00 : f32
    %81 = vector.broadcast %cst_40 : f32 to vector<64x32xf32>
    %82 = arith.addf %81, %80 : vector<64x32xf32>
    %83 = math.log %82 : vector<64x32xf32>
    %84 = arith.addf %76, %83 : vector<64x32xf32>
    %c0_41 = arith.constant 0 : index
    %c128 = arith.constant 128 : index
    %85 = vector.load %arg23[%c0_41, %c128] : memref<64x160xf32, #tpu.memory_space<vmem>>, vector<64x32xf32>
    tpu.vector_store %arg23[%c0_41, %c128], %84 {strides = array<i32>} : memref<64x160xf32, #tpu.memory_space<vmem>>, vector<64x32xf32>,
    %c0_42 = arith.constant 0 : index
    %c0_43 = arith.constant 0 : index
    %86 = vector.load %arg9[%c0_42, %c0_43] : memref<16x32xf32, #tpu.memory_space<vmem>>, vector<16x32xf32>
    %c0_44 = arith.constant 0 : index
    %c0_45 = arith.constant 0 : index
    %87 = vector.load %arg14[%c0_44, %c0_45] : memref<128x8xf32, #tpu.memory_space<vmem>>, vector<128x8xf32>
    %c0_46 = arith.constant 0 : index
    %c0_47 = arith.constant 0 : index
    %88 = vector.load %arg15[%c0_46, %c0_47] : memref<128x64xf32, #tpu.memory_space<vmem>>, vector<128x64xf32>
    %c0_48 = arith.constant 0 : index
    %c0_49 = arith.constant 0 : index
    %89 = vector.load %arg16[%c0_48, %c0_49] : memref<64x32xf32, #tpu.memory_space<vmem>>, vector<64x32xf32>
    %c0_50 = arith.constant 0 : index
    %c0_51 = arith.constant 0 : index
    %90 = vector.load %arg17[%c0_50, %c0_51] : memref<8x128xf32, #tpu.memory_space<vmem>>, vector<8x128xf32>
    %cst_52 = arith.constant 0.000000e+00 : f32
    %91 = vector.broadcast %cst_52 : f32 to vector<16x32xf32>
    %c0_i32 = arith.constant 0 : i32
    %c8_i32 = arith.constant 8 : i32
    %92 = arith.addi %c0_i32, %c8_i32 : i32
    %c1_i32 = arith.constant 1 : i32
    %93 = scf.for %arg25 = %c0_i32 to %92 step %c1_i32 iter_args(%arg26 = %91) -> (vector<16x32xf32>)  : i32 {
      %c8_i32_88 = arith.constant 8 : i32
      %148 = arith.muli %arg25, %c8_i32_88 : i32
      %149 = tpu.assume_multiple %148, 8 : i32
      %150 = arith.index_cast %149 : i32 to index
      %c0_89 = arith.constant 0 : index
      %151 = vector.load %arg23[%150, %c0_89] : memref<64x160xf32, #tpu.memory_space<vmem>>, vector<8x160xf32>
      %152 = vector.extract_strided_slice %151 {offsets = [0, 0], sizes = [8, 64], strides = [1, 1]} : vector<8x160xf32> to vector<8x64xf32>
      %153 = vector.extract_strided_slice %151 {offsets = [0, 64], sizes = [8, 64], strides = [1, 1]} : vector<8x160xf32> to vector<8x64xf32>
      %154 = vector.extract_strided_slice %151 {offsets = [0, 128], sizes = [8, 32], strides = [1, 1]} : vector<8x160xf32> to vector<8x32xf32>
      %155 = arith.index_cast %149 : i32 to index
      %c0_90 = arith.constant 0 : index
      %156 = vector.load %arg22[%155, %c0_90] : memref<64x32xf32, #tpu.memory_space<vmem>>, vector<8x32xf32>
      %157 = arith.mulf %154, %156 : vector<8x32xf32>
      %cst_91 = arith.constant dense<0.000000e+00> : vector<128x64xf32>
      %158 = tpu.matmul %87, %152, %cst_91 {dimension_numbers = #tpu.dot_dimension_numbers<[1], [0], [0], [1], [0, 0, 1, 1], [], []>} : vector<128x8xf32>, vector<8x64xf32>, vector<128x64xf32> -> vector<128x64xf32>
      %159 = arith.mulf %158, %88 : vector<128x64xf32>
      %cst_92 = arith.constant dense<0.000000e+00> : vector<128x32xf32>
      %160 = tpu.matmul %159, %89, %cst_92 {dimension_numbers = #tpu.dot_dimension_numbers<[1], [0], [0], [1], [0, 0, 1, 1], [], []>} : vector<128x64xf32>, vector<64x32xf32>, vector<128x32xf32> -> vector<128x32xf32>
      %cst_93 = arith.constant dense<0.000000e+00> : vector<128x64xf32>
      %161 = tpu.matmul %87, %153, %cst_93 {dimension_numbers = #tpu.dot_dimension_numbers<[1], [0], [0], [1], [0, 0, 1, 1], [], []>} : vector<128x8xf32>, vector<8x64xf32>, vector<128x64xf32> -> vector<128x64xf32>
      %162 = arith.mulf %161, %88 : vector<128x64xf32>
      %cst_94 = arith.constant dense<0.000000e+00> : vector<128x32xf32>
      %163 = tpu.matmul %162, %89, %cst_94 {dimension_numbers = #tpu.dot_dimension_numbers<[1], [0], [0], [1], [0, 0, 1, 1], [], []>} : vector<128x64xf32>, vector<64x32xf32>, vector<128x32xf32> -> vector<128x32xf32>
      %164 = vector.extract_strided_slice %154 {offsets = [0, 0], sizes = [1, 32], strides = [1, 1]} : vector<8x32xf32> to vector<1x32xf32>
      %165 = vector.broadcast %164 : vector<1x32xf32> to vector<16x32xf32>
      %166 = arith.mulf %86, %165 : vector<16x32xf32>
      %167 = math.exp %166 : vector<16x32xf32>
      %168 = vector.extract_strided_slice %154 {offsets = [1, 0], sizes = [1, 32], strides = [1, 1]} : vector<8x32xf32> to vector<1x32xf32>
      %169 = vector.broadcast %168 : vector<1x32xf32> to vector<16x32xf32>
      %170 = arith.mulf %86, %169 : vector<16x32xf32>
      %171 = math.exp %170 : vector<16x32xf32>
      %172 = vector.extract_strided_slice %154 {offsets = [2, 0], sizes = [1, 32], strides = [1, 1]} : vector<8x32xf32> to vector<1x32xf32>
      %173 = vector.broadcast %172 : vector<1x32xf32> to vector<16x32xf32>
      %174 = arith.mulf %86, %173 : vector<16x32xf32>
      %175 = math.exp %174 : vector<16x32xf32>
      %176 = vector.extract_strided_slice %154 {offsets = [3, 0], sizes = [1, 32], strides = [1, 1]} : vector<8x32xf32> to vector<1x32xf32>
      %177 = vector.broadcast %176 : vector<1x32xf32> to vector<16x32xf32>
      %178 = arith.mulf %86, %177 : vector<16x32xf32>
      %179 = math.exp %178 : vector<16x32xf32>
      %180 = vector.extract_strided_slice %154 {offsets = [4, 0], sizes = [1, 32], strides = [1, 1]} : vector<8x32xf32> to vector<1x32xf32>
      %181 = vector.broadcast %180 : vector<1x32xf32> to vector<16x32xf32>
      %182 = arith.mulf %86, %181 : vector<16x32xf32>
      %183 = math.exp %182 : vector<16x32xf32>
      %184 = vector.extract_strided_slice %154 {offsets = [5, 0], sizes = [1, 32], strides = [1, 1]} : vector<8x32xf32> to vector<1x32xf32>
      %185 = vector.broadcast %184 : vector<1x32xf32> to vector<16x32xf32>
      %186 = arith.mulf %86, %185 : vector<16x32xf32>
      %187 = math.exp %186 : vector<16x32xf32>
      %188 = vector.extract_strided_slice %154 {offsets = [6, 0], sizes = [1, 32], strides = [1, 1]} : vector<8x32xf32> to vector<1x32xf32>
      %189 = vector.broadcast %188 : vector<1x32xf32> to vector<16x32xf32>
      %190 = arith.mulf %86, %189 : vector<16x32xf32>
      %191 = math.exp %190 : vector<16x32xf32>
      %192 = vector.extract_strided_slice %154 {offsets = [7, 0], sizes = [1, 32], strides = [1, 1]} : vector<8x32xf32> to vector<1x32xf32>
      %193 = vector.broadcast %192 : vector<1x32xf32> to vector<16x32xf32>
      %194 = arith.mulf %86, %193 : vector<16x32xf32>
      %195 = math.exp %194 : vector<16x32xf32>
      %196 = vector.extract_strided_slice %160 {offsets = [0, 0], sizes = [16, 32], strides = [1, 1]} : vector<128x32xf32> to vector<16x32xf32>
      %197 = vector.extract_strided_slice %157 {offsets = [0, 0], sizes = [1, 32], strides = [1, 1]} : vector<8x32xf32> to vector<1x32xf32>
      %198 = vector.broadcast %197 : vector<1x32xf32> to vector<16x32xf32>
      %199 = arith.mulf %196, %198 : vector<16x32xf32>
      %200 = vector.extract_strided_slice %160 {offsets = [16, 0], sizes = [16, 32], strides = [1, 1]} : vector<128x32xf32> to vector<16x32xf32>
      %201 = vector.extract_strided_slice %157 {offsets = [1, 0], sizes = [1, 32], strides = [1, 1]} : vector<8x32xf32> to vector<1x32xf32>
      %202 = vector.broadcast %201 : vector<1x32xf32> to vector<16x32xf32>
      %203 = arith.mulf %200, %202 : vector<16x32xf32>
      %204 = vector.extract_strided_slice %160 {offsets = [32, 0], sizes = [16, 32], strides = [1, 1]} : vector<128x32xf32> to vector<16x32xf32>
      %205 = vector.extract_strided_slice %157 {offsets = [2, 0], sizes = [1, 32], strides = [1, 1]} : vector<8x32xf32> to vector<1x32xf32>
      %206 = vector.broadcast %205 : vector<1x32xf32> to vector<16x32xf32>
      %207 = arith.mulf %204, %206 : vector<16x32xf32>
      %208 = vector.extract_strided_slice %160 {offsets = [48, 0], sizes = [16, 32], strides = [1, 1]} : vector<128x32xf32> to vector<16x32xf32>
      %209 = vector.extract_strided_slice %157 {offsets = [3, 0], sizes = [1, 32], strides = [1, 1]} : vector<8x32xf32> to vector<1x32xf32>
      %210 = vector.broadcast %209 : vector<1x32xf32> to vector<16x32xf32>
      %211 = arith.mulf %208, %210 : vector<16x32xf32>
      %212 = vector.extract_strided_slice %160 {offsets = [64, 0], sizes = [16, 32], strides = [1, 1]} : vector<128x32xf32> to vector<16x32xf32>
      %213 = vector.extract_strided_slice %157 {offsets = [4, 0], sizes = [1, 32], strides = [1, 1]} : vector<8x32xf32> to vector<1x32xf32>
      %214 = vector.broadcast %213 : vector<1x32xf32> to vector<16x32xf32>
      %215 = arith.mulf %212, %214 : vector<16x32xf32>
      %216 = vector.extract_strided_slice %160 {offsets = [80, 0], sizes = [16, 32], strides = [1, 1]} : vector<128x32xf32> to vector<16x32xf32>
      %217 = vector.extract_strided_slice %157 {offsets = [5, 0], sizes = [1, 32], strides = [1, 1]} : vector<8x32xf32> to vector<1x32xf32>
      %218 = vector.broadcast %217 : vector<1x32xf32> to vector<16x32xf32>
      %219 = arith.mulf %216, %218 : vector<16x32xf32>
      %220 = vector.extract_strided_slice %160 {offsets = [96, 0], sizes = [16, 32], strides = [1, 1]} : vector<128x32xf32> to vector<16x32xf32>
      %221 = vector.extract_strided_slice %157 {offsets = [6, 0], sizes = [1, 32], strides = [1, 1]} : vector<8x32xf32> to vector<1x32xf32>
      %222 = vector.broadcast %221 : vector<1x32xf32> to vector<16x32xf32>
      %223 = arith.mulf %220, %222 : vector<16x32xf32>
      %224 = vector.extract_strided_slice %160 {offsets = [112, 0], sizes = [16, 32], strides = [1, 1]} : vector<128x32xf32> to vector<16x32xf32>
      %225 = vector.extract_strided_slice %157 {offsets = [7, 0], sizes = [1, 32], strides = [1, 1]} : vector<8x32xf32> to vector<1x32xf32>
      %226 = vector.broadcast %225 : vector<1x32xf32> to vector<16x32xf32>
      %227 = arith.mulf %224, %226 : vector<16x32xf32>
      %228 = arith.mulf %arg26, %167 : vector<16x32xf32>
      %229 = arith.addf %228, %199 : vector<16x32xf32>
      %230 = vector.extract_strided_slice %163 {offsets = [0, 0], sizes = [16, 32], strides = [1, 1]} : vector<128x32xf32> to vector<16x32xf32>
      %231 = arith.mulf %230, %229 : vector<16x32xf32>
      %232 = arith.mulf %229, %171 : vector<16x32xf32>
      %233 = arith.addf %232, %203 : vector<16x32xf32>
      %234 = vector.extract_strided_slice %163 {offsets = [16, 0], sizes = [16, 32], strides = [1, 1]} : vector<128x32xf32> to vector<16x32xf32>
      %235 = arith.mulf %234, %233 : vector<16x32xf32>
      %236 = arith.mulf %233, %175 : vector<16x32xf32>
      %237 = arith.addf %236, %207 : vector<16x32xf32>
      %238 = vector.extract_strided_slice %163 {offsets = [32, 0], sizes = [16, 32], strides = [1, 1]} : vector<128x32xf32> to vector<16x32xf32>
      %239 = arith.mulf %238, %237 : vector<16x32xf32>
      %240 = arith.mulf %237, %179 : vector<16x32xf32>
      %241 = arith.addf %240, %211 : vector<16x32xf32>
      %242 = vector.extract_strided_slice %163 {offsets = [48, 0], sizes = [16, 32], strides = [1, 1]} : vector<128x32xf32> to vector<16x32xf32>
      %243 = arith.mulf %242, %241 : vector<16x32xf32>
      %244 = arith.mulf %241, %183 : vector<16x32xf32>
      %245 = arith.addf %244, %215 : vector<16x32xf32>
      %246 = vector.extract_strided_slice %163 {offsets = [64, 0], sizes = [16, 32], strides = [1, 1]} : vector<128x32xf32> to vector<16x32xf32>
      %247 = arith.mulf %246, %245 : vector<16x32xf32>
      %248 = arith.mulf %245, %187 : vector<16x32xf32>
      %249 = arith.addf %248, %219 : vector<16x32xf32>
      %250 = vector.extract_strided_slice %163 {offsets = [80, 0], sizes = [16, 32], strides = [1, 1]} : vector<128x32xf32> to vector<16x32xf32>
      %251 = arith.mulf %250, %249 : vector<16x32xf32>
      %252 = arith.mulf %249, %191 : vector<16x32xf32>
      %253 = arith.addf %252, %223 : vector<16x32xf32>
      %254 = vector.extract_strided_slice %163 {offsets = [96, 0], sizes = [16, 32], strides = [1, 1]} : vector<128x32xf32> to vector<16x32xf32>
      %255 = arith.mulf %254, %253 : vector<16x32xf32>
      %256 = arith.mulf %253, %195 : vector<16x32xf32>
      %257 = arith.addf %256, %227 : vector<16x32xf32>
      %258 = vector.extract_strided_slice %163 {offsets = [112, 0], sizes = [16, 32], strides = [1, 1]} : vector<128x32xf32> to vector<16x32xf32>
      %259 = arith.mulf %258, %257 : vector<16x32xf32>
      %260 = tpu.concatenate %231, %235, %239, %243, %247, %251, %255, %259 in 0 : vector<16x32xf32>, vector<16x32xf32>, vector<16x32xf32>, vector<16x32xf32>, vector<16x32xf32>, vector<16x32xf32>, vector<16x32xf32>, vector<16x32xf32> -> vector<128x32xf32>
      %cst_95 = arith.constant dense<0.000000e+00> : vector<8x32xf32>
      %261 = tpu.matmul %90, %260, %cst_95 {dimension_numbers = #tpu.dot_dimension_numbers<[1], [0], [0], [1], [0, 0, 1, 1], [], []>} : vector<8x128xf32>, vector<128x32xf32>, vector<8x32xf32> -> vector<8x32xf32>
      %262 = arith.index_cast %149 : i32 to index
      %c0_96 = arith.constant 0 : index
      %263 = vector.load %arg24[%262, %c0_96] : memref<64x32xf32, #tpu.memory_space<vmem>>, vector<8x32xf32>
      tpu.vector_store %arg24[%262, %c0_96], %261 {strides = array<i32>} : memref<64x32xf32, #tpu.memory_space<vmem>>, vector<8x32xf32>,
      scf.yield %257 : vector<16x32xf32>
    }
    %c8_i32_53 = arith.constant 8 : i32
    %c0_54 = arith.constant 0 : index
    %c0_55 = arith.constant 0 : index
    %94 = vector.load %arg24[%c0_54, %c0_55] : memref<64x32xf32, #tpu.memory_space<vmem>>, vector<64x32xf32>
    %c0_56 = arith.constant 0 : index
    %c0_57 = arith.constant 0 : index
    %95 = vector.load %arg22[%c0_56, %c0_57] : memref<64x32xf32, #tpu.memory_space<vmem>>, vector<64x32xf32>
    %c0_58 = arith.constant 0 : index
    %c0_59 = arith.constant 0 : index
    %96 = vector.load %arg10[%c0_58, %c0_59] : memref<1x32xf32, #tpu.memory_space<vmem>>, vector<1x32xf32>
    %97 = vector.broadcast %96 : vector<1x32xf32> to vector<64x32xf32>
    %98 = arith.mulf %95, %97 : vector<64x32xf32>
    %99 = arith.addf %94, %98 : vector<64x32xf32>
    %c0_60 = arith.constant 0 : index
    %c0_61 = arith.constant 0 : index
    %100 = vector.load %arg21[%c0_60, %c0_61] : memref<64x32xf32, #tpu.memory_space<vmem>>, vector<64x32xf32>
    %cst_62 = arith.constant 0.000000e+00 : f32
    %101 = vector.broadcast %cst_62 : f32 to vector<64x32xf32>
    %102 = arith.subf %101, %100 : vector<64x32xf32>
    %103 = math.exp %102 : vector<64x32xf32>
    %cst_63 = arith.constant 1.000000e+00 : f32
    %104 = vector.broadcast %cst_63 : f32 to vector<64x32xf32>
    %105 = arith.addf %104, %103 : vector<64x32xf32>
    %106 = tpu.reciprocal %105 {approx = true} : vector<64x32xf32> -> vector<64x32xf32>
    %107 = arith.mulf %100, %106 : vector<64x32xf32>
    %108 = arith.mulf %99, %107 : vector<64x32xf32>
    %109 = arith.truncf %108 : vector<64x32xf32> to vector<64x32xbf16>
    %c0_64 = arith.constant 0 : index
    %c0_65 = arith.constant 0 : index
    %110 = vector.load %arg11[%c0_64, %c0_65] : memref<32x16xbf16, #tpu.memory_space<vmem>>, vector<32x16xbf16>
    %cst_66 = arith.constant dense<0.000000e+00> : vector<64x16xf32>
    %111 = tpu.matmul %109, %110, %cst_66 {dimension_numbers = #tpu.dot_dimension_numbers<[1], [0], [0], [1], [0, 0, 1, 1], [], []>} : vector<64x32xbf16>, vector<32x16xbf16>, vector<64x16xf32> -> vector<64x16xf32>
    %c0_67 = arith.constant 0 : index
    %c0_68 = arith.constant 0 : index
    %112 = memref.load %arg18[%c0_67, %c0_68] : memref<1x1xf32, #tpu.memory_space<smem>>
    %c0_69 = arith.constant 0 : index
    %c0_70 = arith.constant 0 : index
    %113 = vector.load %arg20[%c0_69, %c0_70] : memref<64x16xf32, #tpu.memory_space<vmem>>, vector<64x16xf32>
    %114 = vector.broadcast %112 : f32 to vector<64x16xf32>
    %115 = arith.mulf %114, %113 : vector<64x16xf32>
    %116 = arith.addf %111, %115 : vector<64x16xf32>
    %c0_71 = arith.constant 0 : index
    %c0_72 = arith.constant 0 : index
    %117 = vector.load %arg2[%c0_71, %c0_72] : memref<1x16xf32, #tpu.memory_space<vmem>>, vector<1x16xf32>
    %c0_73 = arith.constant 0 : index
    %c0_74 = arith.constant 0 : index
    %118 = vector.load %arg3[%c0_73, %c0_74] : memref<1x16xf32, #tpu.memory_space<vmem>>, vector<1x16xf32>
    %cst_75 = arith.constant dense<0.000000e+00> : vector<64xf32>
    %119 = vector.multi_reduction <add>, %116, %cst_75 [1] : vector<64x16xf32> to vector<64xf32>
    %120 = vector.shape_cast %119 : vector<64xf32> to vector<64x1xf32>
    %cst_76 = arith.constant 1.600000e+01 : f32
    %121 = vector.broadcast %cst_76 : f32 to vector<64x1xf32>
    %122 = arith.divf %120, %121 : vector<64x1xf32>
    %123 = vector.broadcast %122 : vector<64x1xf32> to vector<64x16xf32>
    %124 = arith.subf %116, %123 : vector<64x16xf32>
    %125 = arith.mulf %124, %124 : vector<64x16xf32>
    %cst_77 = arith.constant dense<0.000000e+00> : vector<64xf32>
    %126 = vector.multi_reduction <add>, %125, %cst_77 [1] : vector<64x16xf32> to vector<64xf32>
    %127 = vector.shape_cast %126 : vector<64xf32> to vector<64x1xf32>
    %cst_78 = arith.constant 1.600000e+01 : f32
    %128 = vector.broadcast %cst_78 : f32 to vector<64x1xf32>
    %129 = arith.divf %127, %128 : vector<64x1xf32>
    %cst_79 = arith.constant 9.99999974E-6 : f32
    %130 = vector.broadcast %cst_79 : f32 to vector<64x1xf32>
    %131 = arith.addf %129, %130 : vector<64x1xf32>
    %132 = math.rsqrt %131 : vector<64x1xf32>
    %133 = vector.broadcast %132 : vector<64x1xf32> to vector<64x16xf32>
    %134 = arith.mulf %124, %133 : vector<64x16xf32>
    %135 = vector.broadcast %117 : vector<1x16xf32> to vector<64x16xf32>
    %136 = arith.mulf %134, %135 : vector<64x16xf32>
    %137 = vector.broadcast %118 : vector<1x16xf32> to vector<64x16xf32>
    %138 = arith.addf %136, %137 : vector<64x16xf32>
    %139 = arith.truncf %138 : vector<64x16xf32> to vector<64x16xbf16>
    %c0_80 = arith.constant 0 : index
    %c0_81 = arith.constant 0 : index
    %140 = vector.load %arg12[%c0_80, %c0_81] : memref<16x16xbf16, #tpu.memory_space<vmem>>, vector<16x16xbf16>
    %cst_82 = arith.constant dense<0.000000e+00> : vector<64x16xf32>
    %141 = tpu.matmul %139, %140, %cst_82 {dimension_numbers = #tpu.dot_dimension_numbers<[1], [0], [0], [1], [0, 0, 1, 1], [], []>} : vector<64x16xbf16>, vector<16x16xbf16>, vector<64x16xf32> -> vector<64x16xf32>
    %c0_83 = arith.constant 0 : index
    %c0_84 = arith.constant 0 : index
    %142 = vector.load %arg13[%c0_83, %c0_84] : memref<1x16xf32, #tpu.memory_space<vmem>>, vector<1x16xf32>
    %143 = vector.broadcast %142 : vector<1x16xf32> to vector<64x16xf32>
    %144 = arith.addf %141, %143 : vector<64x16xf32>
    %c0_85 = arith.constant 0 : index
    %c0_86 = arith.constant 0 : index
    %c0_87 = arith.constant 0 : index
    %145 = vector.load %arg19[%c0_85, %c0_86, %c0_87] : memref<1x64x16xf32, #tpu.memory_space<vmem>>, vector<1x64x16xf32>
    %146 = vector.shape_cast %145 : vector<1x64x16xf32> to vector<64x16xf32>
    %147 = vector.shape_cast %144 : vector<64x16xf32> to vector<1x64x16xf32>
    tpu.vector_store %arg19[%c0_85, %c0_86, %c0_87], %147 {strides = array<i32>} : memref<1x64x16xf32, #tpu.memory_space<vmem>>, vector<1x64x16xf32>,
    return
  }
  func.func @transform_0(%arg0: i32) -> (i32, i32, i32) {
    %c0_i32 = arith.constant 0 : i32
    %c0_i32_0 = arith.constant 0 : i32
    %c0_i32_1 = arith.constant 0 : i32
    return %arg0, %c0_i32, %c0_i32_0 : i32, i32, i32
  }
  func.func @transform_1(%arg0: i32) -> (i32, i32) {
    %c0_i32 = arith.constant 0 : i32
    %c0_i32_0 = arith.constant 0 : i32
    %c0_i32_1 = arith.constant 0 : i32
    return %c0_i32, %c0_i32_0 : i32, i32
  }
  func.func @transform_2(%arg0: i32) -> (i32, i32) {
    %c0_i32 = arith.constant 0 : i32
    %c0_i32_0 = arith.constant 0 : i32
    %c0_i32_1 = arith.constant 0 : i32
    return %c0_i32, %c0_i32_0 : i32, i32
  }
  func.func @transform_3(%arg0: i32) -> (i32, i32) {
    %c0_i32 = arith.constant 0 : i32
    %c0_i32_0 = arith.constant 0 : i32
    %c0_i32_1 = arith.constant 0 : i32
    return %c0_i32, %c0_i32_0 : i32, i32
  }
  func.func @transform_4(%arg0: i32) -> (i32, i32) {
    %c0_i32 = arith.constant 0 : i32
    %c0_i32_0 = arith.constant 0 : i32
    %c0_i32_1 = arith.constant 0 : i32
    return %c0_i32, %c0_i32_0 : i32, i32
  }
  func.func @transform_5(%arg0: i32) -> (i32, i32) {
    %c0_i32 = arith.constant 0 : i32
    %c0_i32_0 = arith.constant 0 : i32
    %c0_i32_1 = arith.constant 0 : i32
    return %c0_i32, %c0_i32_0 : i32, i32
  }
  func.func @transform_6(%arg0: i32) -> (i32, i32) {
    %c0_i32 = arith.constant 0 : i32
    %c0_i32_0 = arith.constant 0 : i32
    %c0_i32_1 = arith.constant 0 : i32
    return %c0_i32, %c0_i32_0 : i32, i32
  }
  func.func @transform_7(%arg0: i32) -> (i32, i32) {
    %c0_i32 = arith.constant 0 : i32
    %c0_i32_0 = arith.constant 0 : i32
    %c0_i32_1 = arith.constant 0 : i32
    return %c0_i32, %c0_i32_0 : i32, i32
  }
  func.func @transform_8(%arg0: i32) -> (i32, i32) {
    %c0_i32 = arith.constant 0 : i32
    %c0_i32_0 = arith.constant 0 : i32
    %c0_i32_1 = arith.constant 0 : i32
    return %c0_i32, %c0_i32_0 : i32, i32
  }
  func.func @transform_9(%arg0: i32) -> (i32, i32) {
    %c0_i32 = arith.constant 0 : i32
    %c0_i32_0 = arith.constant 0 : i32
    %c0_i32_1 = arith.constant 0 : i32
    return %c0_i32, %c0_i32_0 : i32, i32
  }
  func.func @transform_10(%arg0: i32) -> (i32, i32) {
    %c0_i32 = arith.constant 0 : i32
    %c0_i32_0 = arith.constant 0 : i32
    %c0_i32_1 = arith.constant 0 : i32
    return %c0_i32, %c0_i32_0 : i32, i32
  }
  func.func @transform_11(%arg0: i32) -> (i32, i32) {
    %c0_i32 = arith.constant 0 : i32
    %c0_i32_0 = arith.constant 0 : i32
    %c0_i32_1 = arith.constant 0 : i32
    return %c0_i32, %c0_i32_0 : i32, i32
  }
  func.func @transform_12(%arg0: i32) -> (i32, i32) {
    %c0_i32 = arith.constant 0 : i32
    %c0_i32_0 = arith.constant 0 : i32
    %c0_i32_1 = arith.constant 0 : i32
    return %c0_i32, %c0_i32_0 : i32, i32
  }
  func.func @transform_13(%arg0: i32) -> (i32, i32) {
    %c0_i32 = arith.constant 0 : i32
    %c0_i32_0 = arith.constant 0 : i32
    %c0_i32_1 = arith.constant 0 : i32
    return %c0_i32, %c0_i32_0 : i32, i32
  }
  func.func @transform_14(%arg0: i32) -> (i32, i32) {
    %c0_i32 = arith.constant 0 : i32
    %c0_i32_0 = arith.constant 0 : i32
    %c0_i32_1 = arith.constant 0 : i32
    return %c0_i32, %c0_i32_0 : i32, i32
  }
  func.func @transform_15(%arg0: i32) -> (i32, i32) {
    %c0_i32 = arith.constant 0 : i32
    %c0_i32_0 = arith.constant 0 : i32
    %c0_i32_1 = arith.constant 0 : i32
    return %c0_i32, %c0_i32_0 : i32, i32
  }
  func.func @transform_16(%arg0: i32) -> (i32, i32) {
    %c0_i32 = arith.constant 0 : i32
    %c0_i32_0 = arith.constant 0 : i32
    %c0_i32_1 = arith.constant 0 : i32
    return %c0_i32, %c0_i32_0 : i32, i32
  }
  func.func @transform_17(%arg0: i32) -> (i32, i32) {
    %c0_i32 = arith.constant 0 : i32
    %c0_i32_0 = arith.constant 0 : i32
    %c0_i32_1 = arith.constant 0 : i32
    return %c0_i32, %c0_i32_0 : i32, i32
  }
  func.func @transform_18(%arg0: i32) -> (i32, i32, i32) {
    %c0_i32 = arith.constant 0 : i32
    %c0_i32_0 = arith.constant 0 : i32
    %c0_i32_1 = arith.constant 0 : i32
    return %arg0, %c0_i32, %c0_i32_0 : i32, i32, i32
  }
}

</mosaic_0001>

<bundles_post_ra>
// kernel: tpu_custom_call.1
= control target key start
LH: loop header
LB: loop body
LE: loop exit
PB: predicated region body
PF: predicated region fallthrough
CT: control target
= control target key end

     0   :  { %s3847_s29 = smov 0   ;;  %s4898_s0 = inlined_call_operand.vmem [shape: f32[2,64,16], index: 0, kind: input, shape index: {}]   ;;  %s4899_s1 = inlined_call_operand.vmem [shape: f32[1,16], index: 1, kind: input, shape index: {}]   ;;  %s4900_s2 = inlined_call_operand.vmem [shape: f32[1,16], index: 2, kind: input, shape index: {}]   ;;  %s4901_s3 = inlined_call_operand.vmem [shape: bf16[16,64], index: 3, kind: input, shape index: {}]   ;;  %s4902_s4 = inlined_call_operand.vmem [shape: f32[4,32], index: 4, kind: input, shape index: {}]   ;;  %s4903_s5 = inlined_call_operand.vmem [shape: f32[1,32], index: 5, kind: input, shape index: {}]   ;;  %s4904_s6 = inlined_call_operand.vmem [shape: bf16[32,160], index: 6, kind: input, shape index: {}]   ;;  %s4905_s7 = inlined_call_operand.vmem [shape: f32[1,32], index: 7, kind: input, shape index: {}]   ;;  %s4906_s8 = inlined_call_operand.vmem [shape: f32[16,32], index: 8, kind: input, shape index: {}]   ;;  %s4907_s9 = inlined_call_operand.vmem [shape: f32[1,32], index: 9, kind: input, shape index: {}]   ;;  %s4908_s10 = inlined_call_operand.vmem [shape: bf16[32,16], index: 10, kind: input, shape index: {}]   ;;  %s4909_s11 = inlined_call_operand.vmem [shape: bf16[16,16], index: 11, kind: input, shape index: {}]   ;;  %s4910_s12 = inlined_call_operand.vmem [shape: f32[1,16], index: 12, kind: input, shape index: {}]   ;;  %s4911_s13 = inlined_call_operand.vmem [shape: f32[128,8], index: 13, kind: input, shape index: {}]   ;;  %s4912_s14 = inlined_call_operand.vmem [shape: f32[128,64], index: 14, kind: input, shape index: {}]   ;;  %s4913_s15 = inlined_call_operand.vmem [shape: f32[64,32], index: 15, kind: input, shape index: {}]   ;;  %s4914_s16 = inlined_call_operand.vmem [shape: f32[8,128], index: 16, kind: input, shape index: {}]   ;;  %s4915_s17 = inlined_call_operand.<no memory space> [shape: f32[1,1], index: 17, kind: input, shape index: {}]   ;;  %s4916_s18 = inlined_call_operand.vmem [shape: f32[2,64,16], index: 18, kind: output, shape index: {}]  }
   0x1   :  { %4930 = sst [smem:[#allocation22_spill]] %s4898_s0 }
   0x2   :  { %4931 = sst [smem:[#allocation23_spill]] %s4899_s1 }
   0x3   :  { %4932 = sst [smem:[#allocation24_spill]] %s4900_s2 }
   0x4   :  { %23 = sst [smem:[#allocation7]] %s4915_s17 }
   0x5 LB: > { %s3000_s30 = sadd.s32 4294967295, %s3729_s29   ;;  %p3004_p0 = scmp.ge.s32.totalorder %s3729_s29, 1  ;;  %s3729_s29 = sphi %s3847_s29, %s29_s29  }
   0x6   : > { %p513_p1 = scmp.lt.s32.totalorder %s3729_s29, 3 }
   0x8   : > { %p514_p2 = pnand %p3004_p0, %p513_p1 }
   0xa   : > { %517 = sbr.rel (%p514_p2) target bundleno = 2589 (0xa1d), region = 92 }
  0x11   : > { %p567_p3 = scmp.lt.s32.totalorder %s3000_s30, 1  ;;  %vm588_vm0 = vcmask 130048   ;;  %s4933_s1 = sld [smem:[#allocation22_spill]]  ;;  %v3537_v56 = vld [vmem:[%s4901_s3] sm:$0xff]   ;;  %vm914_vm1 = vcmask 1046528   ;;  %vm973_vm2 = vcmask 1045504  }
  0x12   : > { %3232 = vmatprep.subr.bf16.mxu0 %v3537_v56  ;;  %s4934_s27 = sld [smem:[#allocation23_spill]]  ;;  %vm1030_vm3 = vcmask 1044480   ;;  %s3744_s21 = smov 96   ;;  %vm1127_vm4 = vcmask 261125   ;;  %vm851_vm5 = vcmask 261120   ;;  %vm1136_vm7 = vcmask 258048  }
  0x13   : > { %s4975_s30 = smov (!%p567_p3, %s3000_s30), 1  ;;  %3233 = vmatpush3.bf16.msra.mxu0 %v3537_v56  ;;  %v3540_v56 = vld [vmem:[%s4904_s6 + $0x4] ss:$8 sps:$4 sm:$0xff]   ;;  %vm1147_vm6 = vsmask.f32 5376  ;;  %s4428_s26 = smov 0  }
  0x14   : > { %s3114_s0 = sshll.u32 %s4975_s30, 6  ;;  %1224 = vmatprep.subr.bf16.mxu0 %v3540_v56  ;;  %3487 = vmatprep.subr.bf16.mxu1 %v3540_v56 }
  0x15   : > { %s3861_s2 = scalar_lea.vmem %s4916_s18, %s3114_s0 }
  0x17   : > { %s571_s20 = scalar_lea.vmem %s4933_s1, %s3114_s0  ;;  %s4935_s0 = sld [smem:[#allocation24_spill]] }
  0x18   : > { %v578_v0 = vld [vmem:[%s571_s20] sm:$0xff]  ;;  %v580_v1 = vld [vmem:[%s571_s20 + $0x10] sm:$0xff]  ;;  %v579_v2 = vld [vmem:[%s571_s20 + $0x8] sm:$0xff] }
  0x19   : > { %v589_v3 = vsel %vm588_vm0, %v578_v0, 0.0  ;;  %v595_v4 = vsel %vm588_vm0, %v580_v1, 0.0  ;;  %v581_v5 = vld [vmem:[%s571_s20 + $0x18] sm:$0xff]  ;;  %v592_v6 = vsel %vm588_vm0, %v579_v2, 0.0  ;;  %v582_v8 = vld [vmem:[%s571_s20 + $0x20] sm:$0xff]  ;;  %v583_v9 = vld [vmem:[%s571_s20 + $0x28] sm:$0xff] }
  0x1a   : > { %590 = vadd.xlane.f32.xlu0 %v589_v3  ;;  %596 = vadd.xlane.f32.xlu1 %v595_v4  ;;  %v598_v7 = vsel %vm588_vm0, %v581_v5, 0.0  ;;  %v601_v10 = vsel %vm588_vm0, %v582_v8, 0.0  ;;  %v604_v11 = vsel %vm588_vm0, %v583_v9, 0.0  ;;  %v584_v12 = vld [vmem:[%s571_s20 + $0x30] sm:$0xff]  ;;  %v585_v13 = vld [vmem:[%s571_s20 + $0x38] sm:$0xff] }
  0x1b   : > { %v607_v14 = vsel %vm588_vm0, %v584_v12, 0.0  ;;  %v610_v15 = vsel %vm588_vm0, %v585_v13, 0.0 }
  0x1e   : > { %593 = vadd.xlane.f32.xlu0 %v592_v6  ;;  %599 = vadd.xlane.f32.xlu1 %v598_v7 }
  0x22   : > { %602 = vadd.xlane.f32.xlu0 %v601_v10  ;;  %605 = vadd.xlane.f32.xlu1 %v604_v11 }
  0x26   : > { %608 = vadd.xlane.f32.xlu0 %v607_v14  ;;  %611 = vadd.xlane.f32.xlu1 %v610_v15  ;;  %v3009_v15 = vld [vmem:[%s4934_s27] ss:$0 sm:$0xff] }
  0xa7   : > { %v591_v16 = vpop.xlane.xlu0 %590  ;;  %v597_v17 = vpop.xlane.xlu1 %596 }
  0xa8   : > { %v614_v18 = vmul.f32 0.0625, %v591_v16  ;;  %v616_v19 = vmul.f32 0.0625, %v597_v17 }
  0xaa   : > { %v3871_v20 = vsub.f32 %v578_v0, %v614_v18  ;;  %v3873_v21 = vsub.f32 %v580_v1, %v616_v19  ;;  %v3010_v19 = vld [vmem:[%s4935_s0] ss:$0 sm:$0xff] }
  0xab   : > { %v594_v22 = vpop.xlane.xlu0 %593  ;;  %v600_v23 = vpop.xlane.xlu1 %599 }
  0xac   : > { %v615_v24 = vmul.f32 0.0625, %v594_v22  ;;  %v617_v25 = vmul.f32 0.0625, %v600_v23  ;;  %v630_v26 = vmul.f32 %v3871_v20, %v3871_v20  ;;  %v632_v27 = vmul.f32 %v3873_v21, %v3873_v21 }
  0xae   : > { %v3879_v28 = vsub.f32 %v579_v2, %v615_v24  ;;  %v3881_v29 = vsub.f32 %v581_v5, %v617_v25  ;;  %v638_v30 = vsel %vm588_vm0, %v630_v26, 0.0  ;;  %v644_v33 = vsel %vm588_vm0, %v632_v27, 0.0 }
  0xaf   : > { %639 = vadd.xlane.f32.xlu0 %v638_v30  ;;  %v603_v31 = vpop.xlane.xlu0 %602  ;;  %v606_v32 = vpop.xlane.xlu1 %605 }
  0xb0   : > { %v618_v34 = vmul.f32 0.0625, %v603_v31  ;;  %v619_v35 = vmul.f32 0.0625, %v606_v32  ;;  %v631_v36 = vmul.f32 %v3879_v28, %v3879_v28  ;;  %v633_v37 = vmul.f32 %v3881_v29, %v3881_v29 }
  0xb2   : > { %v3889_v38 = vsub.f32 %v582_v8, %v618_v34  ;;  %v3891_v39 = vsub.f32 %v583_v9, %v619_v35  ;;  %v641_v40 = vsel %vm588_vm0, %v631_v36, 0.0  ;;  %v647_v43 = vsel %vm588_vm0, %v633_v37, 0.0 }
  0xb3   : > { %645 = vadd.xlane.f32.xlu0 %v644_v33  ;;  %642 = vadd.xlane.f32.xlu1 %v641_v40  ;;  %v609_v41 = vpop.xlane.xlu0 %608  ;;  %v612_v42 = vpop.xlane.xlu1 %611 }
  0xb4   : > { %v620_v44 = vmul.f32 0.0625, %v609_v41  ;;  %v621_v45 = vmul.f32 0.0625, %v612_v42  ;;  %v634_v46 = vmul.f32 %v3889_v38, %v3889_v38  ;;  %v635_v47 = vmul.f32 %v3891_v39, %v3891_v39 }
  0xb6   : > { %v3899_v48 = vsub.f32 %v584_v12, %v620_v44  ;;  %v3901_v49 = vsub.f32 %v585_v13, %v621_v45  ;;  %v650_v50 = vsel %vm588_vm0, %v634_v46, 0.0  ;;  %v653_v51 = vsel %vm588_vm0, %v635_v47, 0.0 }
  0xb7   : > { %648 = vadd.xlane.f32.xlu1 %v647_v43  ;;  %651 = vadd.xlane.f32.xlu0 %v650_v50 }
  0xb8   : > { %v636_v52 = vmul.f32 %v3899_v48, %v3899_v48  ;;  %v637_v53 = vmul.f32 %v3901_v49, %v3901_v49 }
  0xba   : > { %v656_v54 = vsel %vm588_vm0, %v636_v52, 0.0  ;;  %v659_v55 = vsel %vm588_vm0, %v637_v53, 0.0 }
  0xbb   : > { %654 = vadd.xlane.f32.xlu1 %v653_v51  ;;  %657 = vadd.xlane.f32.xlu0 %v656_v54 }
  0xbf   : > { %660 = vadd.xlane.f32.xlu1 %v659_v55 }
 0x13c   : > { %v640_v57 = vpop.xlane.xlu0 %639 }
 0x13d   : > { %v662_v58 = vmul.f32 0.0625, %v640_v57  ;;  %v3543_v57 = vld [vmem:[%s4904_s6 + $0x14] ss:$8 sps:$4 sm:$0xff]  }
 0x13f   : > { %v670_v59 = vadd.f32 1e-05, %v662_v58  ;;  %v3743_v58 = vmov 0  }
 0x140   : > { %v643_v60 = vpop.xlane.xlu1 %642  ;;  %v646_v61 = vpop.xlane.xlu0 %645  ;;  %1266 = vmatprep.mubr.bf16.mxu1 %v3743_v58 }
 0x141   : > { %3544 = vrsqrt.f32 %v670_v59  ;;  %v663_v62 = vmul.f32 0.0625, %v643_v60  ;;  %v664_v63 = vmul.f32 0.0625, %v646_v61  ;;  %v3541_v59 = vld [vmem:[%s4904_s6 + $0x10] ss:$8 sps:$4 sm:$0xff]   ;;  %v3957_v60 = vld [vmem:[%s4902_s4 + $0x1] ss:$0 sm:$0xff] }
 0x142   : > { %v3962_v61 = vld [vmem:[%s4902_s4 + $0x2] ss:$0 sm:$0xff] }
 0x143   : > { %v671_v0 = vadd.f32 1e-05, %v663_v62  ;;  %v672_v1 = vadd.f32 1e-05, %v664_v63  ;;  %v3967_v62 = vld [vmem:[%s4902_s4] ss:$0 sm:$0xff] }
 0x144   : > { %v649_v2 = vpop.xlane.xlu1 %648  ;;  %v652_v3 = vpop.xlane.xlu0 %651  ;;  %v873_v63 = vmul.f32 0.0, %v3967_v62 }
 0x145   : > { %3546 = vrsqrt.f32 %v671_v0  ;;  %v665_v4 = vmul.f32 0.0625, %v649_v2  ;;  %v666_v5 = vmul.f32 0.0625, %v652_v3  ;;  %v896_v0 = vmul.f32 0.0, %v3957_v60  ;;  %v3975_v2 = vld [vmem:[%s4903_s5] ss:$0 sm:$0xff] }
 0x146   : > { %3548 = vrsqrt.f32 %v672_v1  ;;  %v955_v1 = vmul.f32 0.0, %v3962_v61  ;;  %v3980_v3 = vld [vmem:[%s4902_s4 + $0x3] ss:$0 sm:$0xff] }
 0x147   : > { %v673_v6 = vadd.f32 1e-05, %v665_v4  ;;  %v674_v7 = vadd.f32 1e-05, %v666_v5  ;;  %v882_v4 = vadd.f32 %v3975_v2, %v873_v63 }
 0x148   : > { %v655_v8 = vpop.xlane.xlu1 %654  ;;  %v658_v9 = vpop.xlane.xlu0 %657 }
 0x149   : > { %3550 = vrsqrt.f32 %v673_v6  ;;  %v667_v10 = vmul.f32 0.0625, %v655_v8  ;;  %v668_v11 = vmul.f32 0.0625, %v658_v9  ;;  %v915_v6 = vrot.slane %v896_v0, 1 }
 0x14a   : > { %3552 = vrsqrt.f32 %v674_v7  ;;  %v974_v7 = vrot.slane %v955_v1, 2 }
 0x14b   : > { %v3545_v12 = vpop.eup %3544  ;;  %v675_v13 = vadd.f32 1e-05, %v667_v10  ;;  %v676_v14 = vadd.f32 1e-05, %v668_v11 }
 0x14c   : > { %v661_v16 = vpop.xlane.xlu1 %660  ;;  %v686_v17 = vmul.f32 %v3545_v12, %v3871_v20 }
 0x14d   : > { %3554 = vrsqrt.f32 %v675_v13  ;;  %v669_v18 = vmul.f32 0.0625, %v661_v16 }
 0x14e   : > { %3556 = vrsqrt.f32 %v676_v14  ;;  %v700_v22 = vmul.f32 %v3009_v15, %v686_v17 }
 0x14f   : > { %v3547_v23 = vpop.eup %3546  ;;  %v677_v24 = vadd.f32 1e-05, %v669_v18 }
 0x150   : > { %v3549_v25 = vpop.eup %3548  ;;  %v687_v26 = vmul.f32 %v3547_v23, %v3879_v28  ;;  %v714_v27 = vadd.f32 %v3010_v19, %v700_v22 }
 0x151   : > { %v688_v30 = vmul.f32 %v3549_v25, %v3873_v21  ;;  %3558 = vrsqrt.f32 %v677_v24 }
 0x152   : > { %v701_v31 = vmul.f32 %v3009_v15, %v687_v26  ;;  %722 = vst.msk [vmem:[#allocation2] sm:$0xff] %vm588_vm0, %v714_v27 }
 0x153   : > { %v3551_v20 = vpop.eup %3550  ;;  %v702_v32 = vmul.f32 %v3009_v15, %v688_v30 }
 0x154   : > { %v3553_v33 = vpop.eup %3552  ;;  %v689_v34 = vmul.f32 %v3551_v20, %v3881_v29  ;;  %v715_v35 = vadd.f32 %v3010_v19, %v701_v31 }
 0x155   : > { %v690_v36 = vmul.f32 %v3553_v33, %v3889_v38  ;;  %v716_v37 = vadd.f32 %v3010_v19, %v702_v32 }
 0x156   : > { %723 = vst.msk [vmem:[#allocation2 + $0x8] sm:$0xff] %vm588_vm0, %v715_v35  ;;  %v730_v40 = vpack.c.bf16 %v715_v35, %v714_v27  ;;  %v703_v28 = vmul.f32 %v3009_v15, %v689_v34 }
 0x157   : > { %v3555_v41 = vpop.eup %3554  ;;  %724 = vst.msk [vmem:[#allocation2 + $0x10] sm:$0xff] %vm588_vm0, %v716_v37  ;;  %v704_v21 = vmul.f32 %v3009_v15, %v690_v36 }
 0x158   : > { %v3557_v42 = vpop.eup %3556  ;;  %v691_v43 = vmul.f32 %v3555_v41, %v3891_v39  ;;  %3234 = vmatprep.mubr.msk.bf16.mxu0 %vm588_vm0, %v730_v40  ;;  %v717_v44 = vadd.f32 %v3010_v19, %v703_v28 }
 0x159   : > { %v692_v29 = vmul.f32 %v3557_v42, %v3899_v48  ;;  %v718_v45 = vadd.f32 %v3010_v19, %v704_v21 }
 0x15a   : > { %725 = vst.msk [vmem:[#allocation2 + $0x18] sm:$0xff] %vm588_vm0, %v717_v44  ;;  %v731_v38 = vpack.c.bf16 %v717_v44, %v716_v37  ;;  %v705_v46 = vmul.f32 %v3009_v15, %v691_v43 }
 0x15b   : > { %v3559_v47 = vpop.eup %3558  ;;  %726 = vst.msk [vmem:[#allocation2 + $0x20] sm:$0xff] %vm588_vm0, %v718_v45  ;;  %v706_v50 = vmul.f32 %v3009_v15, %v692_v29 }
 0x15c   : > { %v693_v51 = vmul.f32 %v3559_v47, %v3901_v49  ;;  %3235 = vmatmul.mubr.msk.bf16.vlgmr.msra.gmra.mrb[0].mxu0 %vm588_vm0, %v731_v38  ;;  %v719_v52 = vadd.f32 %v3010_v19, %v705_v46  ;;  %v3538_v49 = vld [vmem:[%s4904_s6] ss:$8 sps:$4 sm:$0xff]  }
 0x15d   : > { %v720_v39 = vadd.f32 %v3010_v19, %v706_v50  ;;  %1225 = vmatpush1.bf16.msra.mxu0 %v3538_v49  ;;  %3489 = vmatpush1.bf16.msra.mxu1 %v3538_v49 }
 0x15e   : > { %727 = vst.msk [vmem:[#allocation2 + $0x28] sm:$0xff] %vm588_vm0, %v719_v52  ;;  %v732_v53 = vpack.c.bf16 %v719_v52, %v718_v45  ;;  %v707_v54 = vmul.f32 %v3009_v15, %v693_v51  ;;  %1226 = vmatprep.subr.bf16.mxu0 %v3543_v57  ;;  %3488 = vmatprep.subr.bf16.mxu1 %v3543_v57 }
 0x15f   : > { %728 = vst.msk [vmem:[#allocation2 + $0x30] sm:$0xff] %vm588_vm0, %v720_v39 }
 0x160   : > { %3238 = vmatprep.mubr.msk.bf16.mxu0 %vm588_vm0, %v732_v53  ;;  %v721_v48 = vadd.f32 %v3010_v19, %v707_v54 }
 0x161   : > { %1227 = vmatpush1.bf16.msra.mxu0 %v3541_v59  ;;  %3490 = vmatpush1.bf16.msra.mxu1 %v3541_v59 }
 0x162   : > { %729 = vst.msk [vmem:[#allocation2 + $0x38] sm:$0xff] %vm588_vm0, %v721_v48  ;;  %v733_v55 = vpack.c.bf16 %v721_v48, %v720_v39 }
 0x164   : > { %3239 = vmatmul.mubr.msk.bf16.gmra.mrb[4].mxu0 %vm588_vm0, %v733_v55 }
 0x165   : > { %1256 = vmatprep.mubr.bf16.mxu0 %v3743_v58 }
 0x22f   : > { %v3236_v5 = vpop.f32.mrb[0].mxu0 }
 0x230   : > { %v876_v8 = vmul.f32 %v3236_v5, %v3967_v62  ;;  %v899_v9 = vmul.f32 %v3236_v5, %v3957_v60  ;;  %v3986_v10 = vmul.f32 %v3236_v5, %v3962_v61  ;;  %v3989_v11 = vmul.f32 %v3236_v5, %v3980_v3  ;;  %831 = vrot.lane.b32.xlu1 %v3236_v5, %s3744_s21  ;;  %v788_v12 = vpop.f32.mrb[1].mxu0 }
 0x231   : > { %v874_v13 = vmul.f32 %v3967_v62, %v788_v12  ;;  %v897_v14 = vmul.f32 %v3957_v60, %v788_v12  ;;  %v956_v15 = vmul.f32 %v3962_v61, %v788_v12  ;;  %v1014_v16 = vmul.f32 %v3980_v3, %v788_v12  ;;  %827 = vrot.lane.b32.xlu0 %v788_v12, %s3744_s21  ;;  %v3237_v17 = vpop.f32.mrb[2].mxu0 }
 0x232   : > { %v885_v18 = vadd.f32 %v3975_v2, %v876_v8  ;;  %v920_v19 = vrot.slane %v899_v9, 1  ;;  %v979_v22 = vrot.slane %v3986_v10, 2  ;;  %v1034_v23 = vrot.slane %v3989_v11, 3  ;;  %v791_v24 = vpop.f32.mrb[3].mxu0 }
 0x233   : > { %v883_v25 = vadd.f32 %v3975_v2, %v874_v13  ;;  %v916_v26 = vrot.slane %v897_v14, 1  ;;  %v975_v27 = vrot.slane %v956_v15, 2  ;;  %v1031_v30 = vrot.slane %v1014_v16, 3 }
 0x234   : > { %v877_v31 = vmul.f32 %v3237_v17, %v3967_v62  ;;  %v4003_v20 = vmul.f32 %v3237_v17, %v3957_v60  ;;  %v4006_v32 = vmul.f32 %v3237_v17, %v3962_v61  ;;  %v4009_v33 = vmul.f32 %v3237_v17, %v3980_v3  ;;  %833 = vrot.lane.b32.xlu1 %v3237_v17, %s3744_s21 }
 0x235   : > { %v917_v34 = vsel %vm914_vm1, %v915_v6, %v916_v26  ;;  %v976_v35 = vsel %vm973_vm2, %v974_v7, %v975_v27  ;;  %v875_v36 = vmul.f32 %v3967_v62, %v791_v24  ;;  %v898_v37 = vmul.f32 %v3957_v60, %v791_v24 }
 0x236   : > { %v941_v40 = vadd.f32 %v917_v34, %v882_v4  ;;  %v4017_v28 = vadd.f32 %v3975_v2, %v877_v31  ;;  %v922_v41 = vrot.slane %v4003_v20, 1  ;;  %v981_v21 = vrot.slane %v4006_v32, 2 }
 0x237   : > { %v1036_v42 = vrot.slane %v4009_v33, 3  ;;  %v884_v43 = vadd.f32 %v3975_v2, %v875_v36  ;;  %v918_v44 = vrot.slane %v898_v37, 1  ;;  %v957_v29 = vmul.f32 %v3962_v61, %v791_v24  ;;  %v3240_v45 = vpop.f32.mrb[4].mxu0 }
 0x238   : > { %v1000_v38 = vadd.f32 %v976_v35, %v941_v40  ;;  %v923_v46 = vsel %vm914_vm1, %v920_v19, %v922_v41  ;;  %v982_v47 = vsel %vm973_vm2, %v979_v22, %v981_v21  ;;  %v1015_v50 = vmul.f32 %v3980_v3, %v791_v24  ;;  %829 = vrot.lane.b32.xlu1 %v791_v24, %s3744_s21  ;;  %v804_v51 = vpop.f32.mrb[5].mxu0 }
 0x239   : > { %v944_v52 = vadd.f32 %v923_v46, %v885_v18  ;;  %v1037_v39 = vsel %vm1030_vm3, %v1034_v23, %v1036_v42  ;;  %v919_v53 = vsel %vm914_vm1, %v916_v26, %v918_v44  ;;  %v921_v54 = vsel %vm914_vm1, %v918_v44, %v920_v19  ;;  %835 = vrot.lane.b32.xlu0 %v804_v51, %s3744_s21  ;;  %v3241_v48 = vpop.f32.mrb[6].mxu0 }
 0x23a   : > { %v4038_v55 = vadd.f32 %v1031_v30, %v1000_v38  ;;  %v942_v49 = vadd.f32 %v919_v53, %v883_v25  ;;  %v943_v56 = vadd.f32 %v921_v54, %v884_v43  ;;  %v977_v57 = vrot.slane %v957_v29, 2  ;;  %v4040_v59 = vpop.f32.mrb[7].mxu0 }
 0x23b   : > { %v1003_v63 = vadd.f32 %v982_v47, %v944_v52  ;;  %v1032_v0 = vrot.slane %v1015_v50, 3  ;;  %v880_v1 = vmul.f32 %v3240_v45, %v3967_v62  ;;  %v4044_v4 = vmul.f32 %v3240_v45, %v3957_v60 }
 0x23c   : > { %v1064_v5 = vsub.f32 0.0, %v4038_v55  ;;  %v978_v6 = vsel %vm973_vm2, %v975_v27, %v977_v57  ;;  %v980_v7 = vsel %vm973_vm2, %v977_v57, %v979_v22  ;;  %v4050_v8 = vmul.f32 %v3240_v45, %v3962_v61  ;;  %837 = vrot.lane.b32.xlu1 %v4040_v59, %s3744_s21 }
 0x23d   : > { %v4054_v9 = vadd.f32 %v1037_v39, %v1003_v63  ;;  %v1001_v10 = vadd.f32 %v978_v6, %v942_v49  ;;  %v1002_v11 = vadd.f32 %v980_v7, %v943_v56  ;;  %v1033_v12 = vsel %vm1030_vm3, %v1031_v30, %v1032_v0  ;;  %839 = vrot.lane.b32.xlu0 %v3240_v45, %s3744_s21 }
 0x23e   : > { %v1073_v13 = vmul.f32 1.442695, %v1064_v5  ;;  %v1035_v14 = vsel %vm1030_vm3, %v1032_v0, %v1034_v23  ;;  %v889_v15 = vadd.f32 %v3975_v2, %v880_v1  ;;  %v928_v16 = vrot.slane %v4044_v4, 1 }
 0x23f   : > { %v1067_v17 = vsub.f32 0.0, %v4054_v9  ;;  %v4062_v18 = vadd.f32 %v1033_v12, %v1001_v10  ;;  %v4064_v19 = vadd.f32 %v1035_v14, %v1002_v11  ;;  %v987_v22 = vrot.slane %v4050_v8, 2 }
 0x240   : > { %3560 = vpow2.f32 %v1073_v13  ;;  %v4068_v24 = vmul.f32 %v3240_v45, %v3980_v3  ;;  %v878_v25 = vmul.f32 %v3967_v62, %v804_v51  ;;  %v901_v23 = vmul.f32 %v3957_v60, %v804_v51  ;;  %841 = vrot.lane.b32.xlu1 %v3241_v48, %s3744_s21 }
 0x241   : > { %v1079_v26 = vmul.f32 1.442695, %v1067_v17  ;;  %v1065_v27 = vsub.f32 0.0, %v4062_v18  ;;  %v1066_v30 = vsub.f32 0.0, %v4064_v19  ;;  %v960_v31 = vmul.f32 %v3962_v61, %v804_v51 }
 0x242   : > { %v1042_v34 = vrot.slane %v4068_v24, 3  ;;  %v887_v35 = vadd.f32 %v3975_v2, %v878_v25  ;;  %v924_v36 = vrot.slane %v901_v23, 1  ;;  %v4079_v37 = vmul.f32 %v3980_v3, %v804_v51 }
 0x243   : > { %3562 = vpow2.f32 %v1079_v26  ;;  %v1075_v40 = vmul.f32 1.442695, %v1065_v27  ;;  %v1077_v43 = vmul.f32 1.442695, %v1066_v30  ;;  %v983_v44 = vrot.slane %v960_v31, 2 }
 0x244   : > { %v925_v29 = vsel %vm914_vm1, %v922_v41, %v924_v36  ;;  %v1038_v45 = vrot.slane %v4079_v37, 3  ;;  %v881_v38 = vmul.f32 %v3241_v48, %v3967_v62  ;;  %v904_v46 = vmul.f32 %v3241_v48, %v3957_v60 }
 0x245   : > { %3564 = vpow2.f32 %v1075_v40  ;;  %v945_v47 = vadd.f32 %v925_v29, %v4017_v28  ;;  %v984_v50 = vsel %vm973_vm2, %v981_v21, %v983_v44  ;;  %v963_v51 = vmul.f32 %v3241_v48, %v3962_v61 }
 0x246   : > { %3566 = vpow2.f32 %v1077_v43  ;;  %v1039_v20 = vsel %vm1030_vm3, %v1036_v42, %v1038_v45  ;;  %v890_v41 = vadd.f32 %v3975_v2, %v881_v38  ;;  %v930_v52 = vrot.slane %v904_v46, 1 }
 0x247   : > { %v1004_v39 = vadd.f32 %v984_v50, %v945_v47  ;;  %v989_v53 = vrot.slane %v963_v51, 2  ;;  %v1021_v54 = vmul.f32 %v3241_v48, %v3980_v3  ;;  %v879_v28 = vmul.f32 %v3967_v62, %v4040_v59 }
 0x248   : > { %v931_v32 = vsel %vm914_vm1, %v928_v16, %v930_v52  ;;  %v949_v21 = vadd.f32 %v930_v52, %v890_v41  ;;  %v902_v49 = vmul.f32 %v3957_v60, %v4040_v59  ;;  %v961_v33 = vmul.f32 %v3962_v61, %v4040_v59 }
 0x249   : > { %v4104_v42 = vadd.f32 %v1039_v20, %v1004_v39  ;;  %v948_v56 = vadd.f32 %v931_v32, %v889_v15  ;;  %v990_v57 = vsel %vm973_vm2, %v987_v22, %v989_v53  ;;  %v1044_v48 = vrot.slane %v1021_v54, 3 }
 0x24a   : > { %v3561_v63 = vpop.eup %3560  ;;  %v1008_v0 = vadd.f32 %v989_v53, %v949_v21  ;;  %v888_v62 = vadd.f32 %v3975_v2, %v879_v28  ;;  %v926_v1 = vrot.slane %v902_v49, 1  ;;  %v985_v4 = vrot.slane %v961_v33, 2 }
 0x24b   : > { %v1091_v5 = vadd.f32 1.0, %v3561_v63  ;;  %v1068_v60 = vsub.f32 0.0, %v4104_v42  ;;  %v1007_v6 = vadd.f32 %v990_v57, %v948_v56  ;;  %v1045_v61 = vsel %vm1030_vm3, %v1042_v34, %v1044_v48 }
 0x24c   : > { %v4114_v7 = vadd.f32 %v1044_v48, %v1008_v0  ;;  %v927_v10 = vsel %vm914_vm1, %v924_v36, %v926_v1  ;;  %v929_v11 = vsel %vm914_vm1, %v926_v1, %v928_v16  ;;  %v986_v12 = vsel %vm973_vm2, %v983_v44, %v985_v4 }
 0x24d   : > { %v3563_v13 = vpop.eup %3562  ;;  %3568 = vrcp.f32 %v1091_v5  ;;  %v1081_v2 = vmul.f32 1.442695, %v1068_v60  ;;  %v4119_v14 = vadd.f32 %v1045_v61, %v1007_v6  ;;  %v946_v15 = vadd.f32 %v927_v10, %v887_v35 }
 0x24e   : > { %v1094_v17 = vadd.f32 1.0, %v3563_v13  ;;  %v1072_v25 = vsub.f32 0.0, %v4114_v7  ;;  %v947_v23 = vadd.f32 %v929_v11, %v888_v62  ;;  %v988_v26 = vsel %vm973_vm2, %v985_v4, %v987_v22 }
 0x24f   : > { %v3565_v27 = vpop.eup %3564  ;;  %3570 = vpow2.f32 %v1081_v2  ;;  %v1071_v16 = vsub.f32 0.0, %v4119_v14  ;;  %v1005_v30 = vadd.f32 %v986_v12, %v946_v15  ;;  %v1019_v31 = vmul.f32 %v3980_v3, %v4040_v59 }
 0x250   : > { %v3567_v36 = vpop.eup %3566  ;;  %3572 = vrcp.f32 %v1094_v17  ;;  %v1092_v37 = vadd.f32 1.0, %v3565_v27  ;;  %v1006_v35 = vadd.f32 %v988_v26, %v947_v23  ;;  %v1089_v44 = vmul.f32 1.442695, %v1072_v25 }
 0x251   : > { %v1093_v40 = vadd.f32 1.0, %v3567_v36  ;;  %v1087_v43 = vmul.f32 1.442695, %v1071_v16  ;;  %v1040_v29 = vrot.slane %v1019_v31, 3 }
 0x252   : > { %3574 = vrcp.f32 %v1092_v37 }
 0x253   : > { %3576 = vrcp.f32 %v1093_v40  ;;  %v1041_v8 = vsel %vm1030_vm3, %v1038_v45, %v1040_v29  ;;  %v1043_v22 = vsel %vm1030_vm3, %v1040_v29, %v1042_v34 }
 0x254   : > { %3578 = vpow2.f32 %v1087_v43  ;;  %v4132_v38 = vadd.f32 %v1041_v8, %v1005_v30  ;;  %v4134_v3 = vadd.f32 %v1043_v22, %v1006_v35 }
 0x255   : > { %3580 = vpow2.f32 %v1089_v44 }
 0x256   : > { %v1069_v59 = vsub.f32 0.0, %v4132_v38  ;;  %v1070_v46 = vsub.f32 0.0, %v4134_v3 }
 0x257   : > { %v3569_v47 = vpop.eup %3568 }
 0x258   : > { %v1118_v50 = vmul.f32 %v3569_v47, %v4038_v55  ;;  %v1083_v51 = vmul.f32 1.442695, %v1069_v59  ;;  %v1085_v45 = vmul.f32 1.442695, %v1070_v46 }
 0x259   : > { %v3571_v20 = vpop.eup %3570 }
 0x25a   : > { %v3573_v24 = vpop.eup %3572  ;;  %1128 = vst.msk [vmem:[#allocation4 - $0x5] sm:$0xe0] %vm1127_vm4, %v1118_v50  ;;  %v1095_v34 = vadd.f32 1.0, %v3571_v20  ;;  %3582 = vpow2.f32 %v1083_v51 }
 0x25b   : > { %v1121_v41 = vmul.f32 %v3573_v24, %v4054_v9  ;;  %3584 = vpow2.f32 %v1085_v45 }
 0x25c   : > { %v3575_v52 = vpop.eup %3574  ;;  %3586 = vrcp.f32 %v1095_v34 }
 0x25d   : > { %v3577_v39 = vpop.eup %3576  ;;  %1131 = vst.msk [vmem:[#allocation4 + $0x13] sm:$0xff] %vm851_vm5, %v1121_v41  ;;  %v1119_v53 = vmul.f32 %v3575_v52, %v4062_v18  ;;  %v4175_v52 = vld [vmem:[%s4906_s8] sm:$0xff] }
 0x25e   : > { %v3579_v54 = vpop.eup %3578  ;;  %v1120_v55 = vmul.f32 %v3577_v39, %v4064_v19  ;;  %4936 = vst [vmem:[#allocation8_spill] sm:$0xff] %v4175_v52  ;;  %v4180_v39 = vld [vmem:[%s4906_s8 + $0x8] sm:$0xff] }
 0x25f   : > { %v3581_v28 = vpop.eup %3580  ;;  %1129 = vst.msk [vmem:[#allocation4 + $0x3] sm:$0xff] %vm851_vm5, %v1119_v53  ;;  %v1098_v32 = vadd.f32 1.0, %v3579_v54  ;;  %v1138_v21 = vpack.c.bf16 %v1119_v53, %v1118_v50  ;;  %4937 = vst [vmem:[#allocation9_spill] sm:$0xff] %v4180_v39  ;;  %v4185_v53 = vld [vmem:[%s4911_s13] sm:$0xff]  ;;  %v4190_v54 = vld [vmem:[%s4911_s13 + $0x8] sm:$0xff] }
 0x260   : > { %1130 = vst.msk [vmem:[#allocation4 + $0xb] sm:$0xff] %vm851_vm5, %v1120_v55  ;;  %v1099_v49 = vadd.f32 1.0, %v3581_v28  ;;  %v1139_v9 = vpack.c.bf16 %v1121_v41, %v1120_v55  ;;  %v4195_v55 = vld [vmem:[%s4911_s13 + $0x10] sm:$0xff]  ;;  %v4200_v28 = vld [vmem:[%s4911_s13 + $0x18] sm:$0xff] }
 0x261   : > { %3588 = vrcp.f32 %v1098_v32  ;;  %v1149_v33 = vshrl.u32 %v1138_v21, 16  ;;  %v1152_v56 = vshll.u32 %v1138_v21, 16  ;;  %v4205_v32 = vld [vmem:[%s4911_s13 + $0x20] sm:$0xff]  ;;  %v4210_v21 = vld [vmem:[%s4911_s13 + $0x28] sm:$0xff] }
 0x262   : > { %3590 = vrcp.f32 %v1099_v49  ;;  %v1157_v57 = vshrl.u32 %v1139_v9, 16  ;;  %v1160_v48 = vshll.u32 %v1139_v9, 16  ;;  %4938 = vst [vmem:[#allocation10_spill] sm:$0xff] %v4210_v21  ;;  %v4215_v49 = vld [vmem:[%s4911_s13 + $0x30] sm:$0xff]  ;;  %v4220_v9 = vld [vmem:[%s4911_s13 + $0x38] sm:$0xff] }
 0x263   : > { %v1151_v63 = vrot.slane %v1149_v33, 2  ;;  %v1154_v18 = vrot.slane %v1152_v56, 3  ;;  %4939 = vst [vmem:[#allocation11_spill] sm:$0xff] %v4220_v9  ;;  %v4225_v33 = vld [vmem:[%s4911_s13 + $0x40] sm:$0xff]  ;;  %v4230_v56 = vld [vmem:[%s4911_s13 + $0x48] sm:$0xff] }
 0x264   : > { %v3583_v0 = vpop.eup %3582  ;;  %v1159_v62 = vrot.slane %v1157_v57, 2  ;;  %v1162_v19 = vrot.slane %v1160_v48, 3  ;;  %v4235_v57 = vld [vmem:[%s4911_s13 + $0x50] sm:$0xff]  ;;  %v4240_v48 = vld [vmem:[%s4911_s13 + $0x58] sm:$0xff] }
 0x265   : > { %v3585_v1 = vpop.eup %3584  ;;  %v1096_v4 = vadd.f32 1.0, %v3583_v0  ;;  %v1155_v5 = vor.u32 %v1154_v18, %v1151_v63  ;;  %v4245_v63 = vld [vmem:[%s4911_s13 + $0x60] sm:$0xff]  ;;  %v4250_v18 = vld [vmem:[%s4911_s13 + $0x68] sm:$0xff]  ;;  %v4255_v0 = vld [vmem:[%s4911_s13 + $0x70] sm:$0xff] }
 0x266   : > { %v3587_v60 = vpop.eup %3586  ;;  %v1097_v6 = vadd.f32 1.0, %v3585_v1  ;;  %v1163_v61 = vor.u32 %v1162_v19, %v1159_v62  ;;  %4940 = vst [vmem:[#allocation12_spill] sm:$0xff] %v4250_v18  ;;  %4941 = vst [vmem:[#allocation13_spill] sm:$0xff] %v4255_v0  ;;  %v4260_v62 = vld [vmem:[%s4911_s13 + $0x78] sm:$0xff]  ;;  %v4265_v19 = vld [vmem:[%s4912_s14] sm:$0xff] }
 0x267   : > { %3592 = vrcp.f32 %v1096_v4  ;;  %v1122_v10 = vmul.f32 %v3587_v60, %v4104_v42  ;;  %v4270_v1 = vld [vmem:[%s4912_s14 + $0x8] sm:$0xff]  ;;  %v4275_v4 = vld [vmem:[%s4912_s14 + $0x10] sm:$0xff]  ;;  %v4285_v60 = vld [vmem:[%s4912_s14 + $0x20] sm:$0xff] }
 0x268   : > { %3594 = vrcp.f32 %v1097_v6  ;;  %v1164_v11 = vsel %vm1147_vm6, %v1155_v5, %v1163_v61  ;;  %4942 = vst [vmem:[#allocation14_spill] sm:$0xff] %v4270_v1  ;;  %4943 = vst [vmem:[#allocation15_spill] sm:$0xff] %v4275_v4  ;;  %v4280_v5 = vld [vmem:[%s4912_s14 + $0x18] sm:$0xff]  ;;  %v4290_v6 = vld [vmem:[%s4912_s14 + $0x28] sm:$0xff] }
 0x269   : > { %3025 = vmatmul.mubr.msk.bf16.vlgmr.msra.gmra.mrb[8].mxu0 %vm851_vm5, %v1164_v11  ;;  %1132 = vst.msk [vmem:[#allocation4 + $0x1b] sm:$0xff] %vm851_vm5, %v1122_v10  ;;  %v4305_v11 = vld [vmem:[%s4912_s14 + $0x40] sm:$0xff] }
 0x26b   : > { %v3589_v12 = vpop.eup %3588 }
 0x26c   : > { %v3591_v13 = vpop.eup %3590  ;;  %v1125_v2 = vmul.f32 %v3589_v12, %v4119_v14  ;;  %v4310_v12 = vld [vmem:[%s4912_s14 + $0x48] sm:$0xff] }
 0x26d   : > { %v1126_v15 = vmul.f32 %v3591_v13, %v4114_v7  ;;  %v4315_v13 = vld [vmem:[%s4912_s14 + $0x50] sm:$0xff] }
 0x26e   : > { %1135 = vst.msk [vmem:[#allocation4 + $0x33] sm:$0xff] %vm851_vm5, %v1125_v2 }
 0x26f   : > { %1137 = vst.msk [vmem:[#allocation4 + $0x3b] sm:$0x1f] %vm1136_vm7, %v1126_v15  ;;  %v1142_v17 = vpack.c.bf16 %v1126_v15, %v1126_v15  ;;  %v4325_v15 = vld [vmem:[%s4912_s14 + $0x60] sm:$0xff] }
 0x271   : > { %v3593_v25 = vpop.eup %3592  ;;  %v1184_v27 = vshrl.u32 %v1142_v17, 16  ;;  %v1187_v16 = vshll.u32 %v1142_v17, 16  ;;  %v4330_v17 = vld [vmem:[%s4912_s14 + $0x68] sm:$0xff] }
 0x272   : > { %v3595_v42 = vpop.eup %3594  ;;  %v1123_v23 = vmul.f32 %v3593_v25, %v4132_v38  ;;  %v4335_v25 = vld [vmem:[%s4912_s14 + $0x70] sm:$0xff] }
 0x273   : > { %v1124_v26 = vmul.f32 %v3595_v42, %v4134_v3  ;;  %v1186_v35 = vrot.slane %v1184_v27, 2  ;;  %v1189_v40 = vrot.slane %v1187_v16, 3  ;;  %v4340_v42 = vld [vmem:[%s4912_s14 + $0x78] sm:$0xff]  ;;  %v4355_v27 = vld [vmem:[%s4913_s15 + $0x10] sm:$0xff] }
 0x274   : > { %1133 = vst.msk [vmem:[#allocation4 + $0x23] sm:$0xff] %vm851_vm5, %v1123_v23  ;;  %v1140_v30 = vpack.c.bf16 %v1123_v23, %v1122_v10  ;;  %v4300_v10 = vld [vmem:[%s4912_s14 + $0x38] sm:$0xff]  ;;  %v4345_v23 = vld [vmem:[%s4913_s15] sm:$0xff] }
 0x275   : > { %1134 = vst.msk [vmem:[#allocation4 + $0x2b] sm:$0xff] %vm851_vm5, %v1124_v26  ;;  %v1141_v14 = vpack.c.bf16 %v1125_v2, %v1124_v26  ;;  %v1190_v3 = vor.u32 %v1189_v40, %v1186_v35  ;;  %v4320_v2 = vld [vmem:[%s4912_s14 + $0x58] sm:$0xff]  ;;  %4944 = vst [vmem:[#allocation16_spill] sm:$0xff] %v4345_v23  ;;  %v4350_v26 = vld [vmem:[%s4913_s15 + $0x8] sm:$0xff] }
 0x276   : > { %v1166_v31 = vshrl.u32 %v1140_v30, 16  ;;  %v1169_v7 = vshll.u32 %v1140_v30, 16  ;;  %4945 = vst [vmem:[#allocation17_spill] sm:$0xff] %v4350_v26  ;;  %v4360_v16 = vld [vmem:[%s4913_s15 + $0x18] sm:$0xff]  ;;  %v4365_v30 = vld [vmem:[%s4913_s15 + $0x20] sm:$0xff] }
 0x277   : > { %v1175_v36 = vshrl.u32 %v1141_v14, 16  ;;  %v1178_v37 = vshll.u32 %v1141_v14, 16  ;;  %4946 = vst [vmem:[#allocation18_spill] sm:$0xff] %v4360_v16  ;;  %v4370_v14 = vld [vmem:[%s4913_s15 + $0x28] sm:$0xff] }
 0x278   : > { %v1168_v43 = vrot.slane %v1166_v31, 2  ;;  %v1171_v44 = vrot.slane %v1169_v7, 3  ;;  %4947 = vst [vmem:[#allocation19_spill] sm:$0xff] %v4370_v14  ;;  %v4375_v31 = vld [vmem:[%s4913_s15 + $0x30] sm:$0xff]  ;;  %v4380_v7 = vld [vmem:[%s4913_s15 + $0x38] sm:$0xff] }
 0x279   : > { %v1177_v29 = vrot.slane %v1175_v36, 2  ;;  %v1180_v8 = vrot.slane %v1178_v37, 3  ;;  %4948 = vst [vmem:[#allocation20_spill] sm:$0xff] %v4380_v7  ;;  %v4385_v36 = vld [vmem:[%s4914_s16] sm:$0xff] }
 0x27a   : > { %v1172_v22 = vor.u32 %v1171_v44, %v1168_v43  ;;  %4949 = vst [vmem:[#allocation21_spill] sm:$0xff] %v4385_v36  ;;  %v4390_v37 = vld [vmem:[%s4905_s7] ss:$0 sm:$0xff] }
 0x27b   : > { %v1181_v38 = vor.u32 %v1180_v8, %v1177_v29 }
 0x27c   : > { %v1173_v59 = vsel %vm1147_vm6, %v1163_v61, %v1172_v22  ;;  %v4295_v61 = vld [vmem:[%s4912_s14 + $0x30] sm:$0xff] }
 0x27d   : > { %3026 = vmatmul.mubr.msk.bf16.vlgmr.msra.gmra.mrb[0].mxu1 %vm851_vm5, %v1173_v59  ;;  %v1182_v46 = vsel %vm1147_vm6, %v1172_v22, %v1181_v38  ;;  %v1191_v47 = vsel %vm1147_vm6, %v1181_v38, %v1190_v3 }
 0x27e   : > { %1276 = vmatprep.mubr.bf16.mxu1 %v3743_v58 }
 0x285   : > { %3027 = vmatmul.mubr.msk.bf16.gmra.mrb[4].mxu1 %vm851_vm5, %v1182_v46 }
 0x286   : > { %1286 = vmatprep.mubr.bf16.mxu1 %v3743_v58 }
 0x28d   : > { %3028 = vmatmul.mubr.msk.bf16.gmra.mrb[8].mxu1 %vm851_vm5, %v1191_v47 }
 0x2a2   : > { %v832_v50 = vpop.permute.xlu1 %831 }
 0x2a3   : > { %854 = vst.msk [vmem:[#allocation3 + $0x10] sm:$0xff] %vm851_vm5, %v832_v50  ;;  %v828_v51 = vpop.permute.xlu0 %827 }
 0x2a4   : > { %852 = vst.msk [vmem:[#allocation3] sm:$0xff] %vm851_vm5, %v828_v51 }
 0x2a6   : > { %v834_v45 = vpop.permute.xlu1 %833 }
 0x2a7   : > { %855 = vst.msk [vmem:[#allocation3 + $0x18] sm:$0xff] %vm851_vm5, %v834_v45 }
 0x2aa   : > { %v830_v20 = vpop.permute.xlu1 %829 }
 0x2ab   : > { %853 = vst.msk [vmem:[#allocation3 + $0x8] sm:$0xff] %vm851_vm5, %v830_v20  ;;  %v836_v24 = vpop.permute.xlu0 %835 }
 0x2ac   : > { %856 = vst.msk [vmem:[#allocation3 + $0x20] sm:$0xff] %vm851_vm5, %v836_v24 }
 0x2ae   : > { %v838_v34 = vpop.permute.xlu1 %837 }
 0x2af   : > { %857 = vst.msk [vmem:[#allocation3 + $0x28] sm:$0xff] %vm851_vm5, %v838_v34  ;;  %v840_v58 = vpop.permute.xlu0 %839 }
 0x2b0   : > { %858 = vst.msk [vmem:[#allocation3 + $0x30] sm:$0xff] %vm851_vm5, %v840_v58 }
 0x2b2   : > { %v842_v41 = vpop.permute.xlu1 %841 }
 0x2b3   : > { %859 = vst.msk [vmem:[#allocation3 + $0x38] sm:$0xff] %vm851_vm5, %v842_v41 }
 0x33c   : > { %v1258_v35 = vpop.f32.mrb[8].mxu0 }
 0x33d   : > { %1297 = vst [vmem:[#allocation5] sm:$0xff] %v1258_v35  ;;  %v1260_v40 = vpop.f32.mrb[9].mxu0 }
 0x33e   : > { %v1312_v43 = vadd.f32 %v4390_v37, %v1260_v40  ;;  %v1262_v44 = vpop.f32.mrb[10].mxu0 }
 0x33f   : > { %1298 = vst [vmem:[#allocation5 + $0x10] sm:$0xff] %v1262_v44  ;;  %v1264_v29 = vpop.f32.mrb[11].mxu0 }
 0x340   : > { %v1328_v8 = vand.u32 2147483647, %v1312_v43  ;;  %v1313_v22 = vadd.f32 %v4390_v37, %v1264_v29 }
 0x342   : > { %v1336_v38 = vsub.f32 0.0, %v1328_v8  ;;  %v1329_v3 = vand.u32 2147483647, %v1313_v22 }
 0x344   : > { %v1344_v59 = vmul.f32 1.442695, %v1336_v38  ;;  %v1337_v46 = vsub.f32 0.0, %v1329_v3 }
 0x346   : > { %3596 = vpow2.f32 %v1344_v59  ;;  %v1346_v47 = vmul.f32 1.442695, %v1337_v46 }
 0x348   : > { %3598 = vpow2.f32 %v1346_v47 }
 0x350   : > { %v3597_v50 = vpop.eup %3596  ;;  %v1268_v51 = vpop.f32.mrb[0].mxu1 }
 0x351   : > { %v1360_v45 = vadd.f32 1.0, %v3597_v50  ;;  %1299 = vst [vmem:[#allocation5 + $0x20] sm:$0xff] %v1268_v51  ;;  %v1270_v20 = vpop.f32.mrb[1].mxu1 }
 0x352   : > { %v3599_v24 = vpop.eup %3598  ;;  %v4395_v34 = vadd.f32 %v4390_v37, %v1270_v20  ;;  %v1272_v58 = vpop.f32.mrb[2].mxu1 }
 0x353   : > { %3600 = vlog2.f32 %v1360_v45  ;;  %v1361_v41 = vadd.f32 1.0, %v3599_v24  ;;  %1300 = vst [vmem:[#allocation5 + $0x30] sm:$0xff] %v1272_v58  ;;  %v1274_v35 = vpop.f32.mrb[3].mxu1 }
 0x354   : > { %v1330_v40 = vand.u32 2147483647, %v4395_v34  ;;  %v4399_v44 = vadd.f32 %v4390_v37, %v1274_v35 }
 0x355   : > { %3602 = vlog2.f32 %v1361_v41  ;;  %v1320_v41 = vmax.f32 %v1312_v43, 0.0 }
 0x356   : > { %v1338_v29 = vsub.f32 0.0, %v1330_v40  ;;  %v1331_v8 = vand.u32 2147483647, %v4399_v44 }
 0x358   : > { %v1348_v38 = vmul.f32 1.442695, %v1338_v29  ;;  %v1339_v3 = vsub.f32 0.0, %v1331_v8  ;;  %v1278_v59 = vpop.f32.mrb[4].mxu1 }
 0x359   : > { %1301 = vst [vmem:[#allocation5 + $0x40] sm:$0xff] %v1278_v59  ;;  %v1280_v46 = vpop.f32.mrb[5].mxu1 }
 0x35a   : > { %3604 = vpow2.f32 %v1348_v38  ;;  %v1350_v47 = vmul.f32 1.442695, %v1339_v3  ;;  %v4403_v50 = vadd.f32 %v4390_v37, %v1280_v46  ;;  %v1282_v51 = vpop.f32.mrb[6].mxu1  ;;  %v1321_v38 = vmax.f32 %v1313_v22, 0.0 }
 0x35b   : > { %1302 = vst [vmem:[#allocation5 + $0x50] sm:$0xff] %v1282_v51  ;;  %v1284_v45 = vpop.f32.mrb[7].mxu1 }
 0x35c   : > { %3606 = vpow2.f32 %v1350_v47  ;;  %v1332_v20 = vand.u32 2147483647, %v4403_v50  ;;  %v4407_v24 = vadd.f32 %v4390_v37, %v1284_v45 }
 0x35d   : > { %v3601_v58 = vpop.eup %3600 }
 0x35e   : > { %v1369_v35 = vmul.f32 0.6931472, %v3601_v58  ;;  %v1340_v40 = vsub.f32 0.0, %v1332_v20  ;;  %v1333_v29 = vand.u32 2147483647, %v4407_v24 }
 0x35f   : > { %v3603_v8 = vpop.eup %3602 }
 0x360   : > { %v1384_v3 = vadd.f32 %v1369_v35, %v1320_v41  ;;  %v1371_v59 = vmul.f32 0.6931472, %v3603_v8  ;;  %v1352_v46 = vmul.f32 1.442695, %v1340_v40  ;;  %v1341_v36 = vsub.f32 0.0, %v1333_v29  ;;  %v1288_v51 = vpop.f32.mrb[8].mxu1 }
 0x361   : > { %1303 = vst [vmem:[#allocation5 + $0x60] sm:$0xff] %v1288_v51  ;;  %v1290_v47 = vpop.f32.mrb[9].mxu1 }
 0x362   : > { %1392 = vst.msk [vmem:[#allocation5 + $0x8] sm:$0xff] %vm851_vm5, %v1384_v3  ;;  %v1385_v52 = vadd.f32 %v1371_v59, %v1321_v38  ;;  %3608 = vpow2.f32 %v1352_v46  ;;  %v1354_v45 = vmul.f32 1.442695, %v1341_v36  ;;  %v1318_v43 = vadd.f32 %v4390_v37, %v1290_v47  ;;  %v1292_v58 = vpop.f32.mrb[10].mxu1 }
 0x363   : > { %1304 = vst [vmem:[#allocation5 + $0x70] sm:$0xff] %v1292_v58  ;;  %v1294_v20 = vpop.f32.mrb[11].mxu1 }
 0x364   : > { %v3605_v39 = vpop.eup %3604  ;;  %1393 = vst.msk [vmem:[#allocation5 + $0x18] sm:$0xff] %vm851_vm5, %v1385_v52  ;;  %3610 = vpow2.f32 %v1354_v45  ;;  %v1334_v22 = vand.u32 2147483647, %v1318_v43  ;;  %v1319_v41 = vadd.f32 %v4390_v37, %v1294_v20 }
 0x365   : > { %v1362_v35 = vadd.f32 1.0, %v3605_v39  ;;  %v1322_v39 = vmax.f32 %v4395_v34, 0.0  ;;  %v1324_v34 = vmax.f32 %v4403_v50, 0.0 }
 0x366   : > { %v3607_v40 = vpop.eup %3606  ;;  %v1342_v29 = vsub.f32 0.0, %v1334_v22  ;;  %v1335_v8 = vand.u32 2147483647, %v1319_v41 }
 0x367   : > { %3612 = vlog2.f32 %v1362_v35  ;;  %v1363_v38 = vadd.f32 1.0, %v3607_v40  ;;  %v1323_v35 = vmax.f32 %v4399_v44, 0.0 }
 0x368   : > { %v1356_v3 = vmul.f32 1.442695, %v1342_v29  ;;  %v1343_v36 = vsub.f32 0.0, %v1335_v8 }
 0x369   : > { %3614 = vlog2.f32 %v1363_v38 }
 0x36a   : > { %3616 = vpow2.f32 %v1356_v3  ;;  %v1358_v59 = vmul.f32 1.442695, %v1343_v36 }
 0x36c   : > { %v3609_v46 = vpop.eup %3608  ;;  %3618 = vpow2.f32 %v1358_v59 }
 0x36d   : > { %v1364_v51 = vadd.f32 1.0, %v3609_v46 }
 0x36e   : > { %v3611_v47 = vpop.eup %3610 }
 0x36f   : > { %3620 = vlog2.f32 %v1364_v51  ;;  %v1365_v52 = vadd.f32 1.0, %v3611_v47  ;;  %v1325_v47 = vmax.f32 %v4407_v24, 0.0  ;;  %v4426_v24 = vmov 0.0  }
 0x371   : > { %v3613_v45 = vpop.eup %3612  ;;  %3622 = vlog2.f32 %v1365_v52 }
 0x372   : > { %v1373_v37 = vmul.f32 0.6931472, %v3613_v45 }
 0x373   : > { %v3615_v58 = vpop.eup %3614 }
 0x374   : > { %v3617_v20 = vpop.eup %3616  ;;  %v1386_v22 = vadd.f32 %v1373_v37, %v1322_v39  ;;  %v1375_v40 = vmul.f32 0.6931472, %v3615_v58  ;;  %v1326_v39 = vmax.f32 %v1318_v43, 0.0 }
 0x375   : > { %v1366_v29 = vadd.f32 1.0, %v3617_v20 }
 0x376   : > { %v3619_v8 = vpop.eup %3618  ;;  %1394 = vst.msk [vmem:[#allocation5 + $0x28] sm:$0xff] %vm851_vm5, %v1386_v22  ;;  %v1387_v38 = vadd.f32 %v1375_v40, %v1323_v35  ;;  %v1327_v22 = vmax.f32 %v1319_v41, 0.0  ;;  %v4424_v40 = vmov 0.0  }
 0x377   : > { %3624 = vlog2.f32 %v1366_v29  ;;  %v1367_v3 = vadd.f32 1.0, %v3619_v8 }
 0x378   : > { %1395 = vst.msk [vmem:[#allocation5 + $0x38] sm:$0xff] %vm851_vm5, %v1387_v38 }
 0x379   : > { %v3621_v36 = vpop.eup %3620  ;;  %3626 = vlog2.f32 %v1367_v3 }
 0x37a   : > { %v1377_v59 = vmul.f32 0.6931472, %v3621_v36 }
 0x37b   : > { %v3623_v46 = vpop.eup %3622 }
 0x37c   : > { %v1388_v51 = vadd.f32 %v1377_v59, %v1324_v34  ;;  %v1379_v44 = vmul.f32 0.6931472, %v3623_v46 }
 0x37e   : > { %1396 = vst.msk [vmem:[#allocation5 + $0x48] sm:$0xff] %vm851_vm5, %v1388_v51  ;;  %v1389_v52 = vadd.f32 %v1379_v44, %v1325_v47 }
 0x380   : > { %1397 = vst.msk [vmem:[#allocation5 + $0x58] sm:$0xff] %vm851_vm5, %v1389_v52 }
 0x381   : > { %v3625_v45 = vpop.eup %3624 }
 0x382   : > { %v1381_v37 = vmul.f32 0.6931472, %v3625_v45 }
 0x383   : > { %v3627_v58 = vpop.eup %3626 }
 0x384   : > { %v1390_v20 = vadd.f32 %v1381_v37, %v1326_v39  ;;  %v1383_v35 = vmul.f32 0.6931472, %v3627_v58 }
 0x386   : > { %1398 = vst.msk [vmem:[#allocation5 + $0x68] sm:$0xff] %vm851_vm5, %v1390_v20  ;;  %v1391_v50 = vadd.f32 %v1383_v35, %v1327_v22 }
 0x388   : > { %1399 = vst.msk [vmem:[#allocation5 + $0x78] sm:$0xff] %vm851_vm5, %v1391_v50 }
 0x389 LB: >> { %v4950_v4 = vld [vmem:[#allocation15_spill] sm:$0xff]  ;;  %v4951_v1 = vld [vmem:[#allocation14_spill] sm:$0xff]  ;;  %v4953_v18 = vld [vmem:[#allocation12_spill] sm:$0xff]  ;;  %vm1462_vm8 = vcmask 64512   ;;  %s4446_s27 = sshll.u32 %s3741_s26, 3  ;;  %s3745_s17 = smov 64   ;;  %s3741_s26 = sphi %s4428_s26, %s1448_s26   ;;  %v3737_v24 = vphi %v4426_v24, %v4971_v24   ;;  %v3733_v40 = vphi %v4424_v40, %v4970_v40  }
 0x38a   : >> { %v4952_v21 = vld [vmem:[#allocation10_spill] sm:$0xff]  ;;  %v4954_v9 = vld [vmem:[#allocation11_spill] sm:$0xff]  ;;  %v4955_v0 = vld [vmem:[#allocation13_spill] sm:$0xff]  ;;  %3244 = vmatprep.mubr.msk.f32.mxu0 %vm1462_vm8, %v4185_v53  ;;  %s1452_s28 = sshra.s32 %s4446_s27, 3  ;;  %vm1672_vm9 = vcmask 523264   ;;  %s1459_s19 = scalar_lea.vmem [#allocation4], %s4446_s27 }
 0x38b   : >> { %v4956_v23 = vld [vmem:[#allocation16_spill] sm:$0xff]  ;;  %v4957_v26 = vld [vmem:[#allocation17_spill] sm:$0xff]  ;;  %v4958_v16 = vld [vmem:[#allocation18_spill] sm:$0xff]  ;;  %s4455_s30 = sshll.u32 %s1452_s28, 4  ;;  %vm3747_vm10 = vmmov 0   ;;  %s2470_s1 = scalar_lea.vmem [#allocation6], %s4446_s27 }
 0x38c   : >> { %v4441_v43 = vpack.c.bf16 %v4957_v26, %v4956_v23  ;;  %v4450_v41 = vpack.c.bf16 %v4958_v16, %v4355_v27  ;;  %s1456_s0 = scalar_lea.vmem [#allocation5], %s4455_s30  ;;  %v4959_v14 = vld [vmem:[#allocation19_spill] sm:$0xff]  ;;  %v4960_v7 = vld [vmem:[#allocation20_spill] sm:$0xff]  ;;  %s1448_s26 = sadd.s32 1, %s3741_s26  }
 0x38d   : >> { %v4467_v8 = vpack.c.bf16 %v4959_v14, %v4365_v30  ;;  %v4475_v38 = vpack.c.bf16 %v4960_v7, %v4375_v31  ;;  %p1445_p4 = scmp.ge.s32.totalorder %s1448_s26, 8  }
 0x38e   : >> { %3491 = vmatprep.subr.bf16.mxu1 %v4441_v43  ;;  %v2480_v27 = vld [vmem:[#allocation4] sm:$0xff] (%p1445_p4)  ;;  %s2583_s26 = sld [smem:[#allocation7]] (%p1445_p4)  ;;  %s4973_s20 = sld [smem:[#allocation24_spill]] (%p1445_p4) }
 0x38f   : >> { %3495 = vmatpush3.bf16.msra.mxu1 %v4441_v43  ;;  %v1457_v29 = vld [vmem:[%s1456_s0] sm:$0xff] }
 0x390   : >> { %3492 = vmatprep.subr.bf16.mxu1 %v4450_v41  ;;  %3242 = vmatprep.subr.mxu0 %v1457_v29  ;;  %v3097_v30 = vld [vmem:[%s4907_s9] ss:$0 sm:$0xff] (%p1445_p4) }
 0x391   : >> { %1867 = vrot.lane.b32.xlu0 %v1457_v29, %s3745_s17  ;;  %3243 = vmatpush3.msra.mxu0 %v1457_v29  ;;  %s4972_s17 = sld [smem:[#allocation23_spill]] (%p1445_p4) }
 0x392   : >> { %3245 = vmatmul.mubr.msk.f32.vlgmr.msra.gmra.mrb[0].mxu0 %vm1462_vm8, %v4190_v54  ;;  %3432 = vmatprep.subr.bf16.mxu0 %v4441_v43 }
 0x393   : >> { %3496 = vmatpush3.bf16.msra.mxu1 %v4450_v41  ;;  %3247 = vmatprep.mubr.msk.f32.mxu0 %vm1462_vm8, %v4195_v55 }
 0x394   : >> { %3434 = vmatpush3.bf16.msra.mxu0 %v4441_v43  ;;  %3493 = vmatprep.subr.bf16.mxu1 %v4467_v8 }
 0x395   : >> { %3436 = vmatprep.subr.bf16.mxu0 %v4450_v41 }
 0x396   : >> { %3248 = vmatmul.mubr.msk.f32.gmra.mrb[2].mxu0 %vm1462_vm8, %v4200_v28 }
 0x397   : >> { %3497 = vmatpush3.bf16.msra.mxu1 %v4467_v8  ;;  %3250 = vmatprep.mubr.msk.f32.mxu0 %vm1462_vm8, %v4205_v32 }
 0x398   : >> { %3494 = vmatprep.subr.bf16.mxu1 %v4475_v38  ;;  %3438 = vmatpush3.bf16.msra.mxu0 %v4450_v41 }
 0x399   : >> { %3440 = vmatprep.subr.bf16.mxu0 %v4467_v8 }
 0x39a   : >> { %3251 = vmatmul.mubr.msk.f32.gmra.mrb[4].mxu0 %vm1462_vm8, %v4952_v21 }
 0x39b   : >> { %3498 = vmatpush3.bf16.msra.mxu1 %v4475_v38  ;;  %3253 = vmatprep.mubr.msk.f32.mxu0 %vm1462_vm8, %v4215_v49 }
 0x39c   : >> { %3448 = vmatprep.subr.bf16.mxu1 %v4441_v43  ;;  %3442 = vmatpush3.bf16.msra.mxu0 %v4467_v8 }
 0x39d   : >> { %3444 = vmatprep.subr.bf16.mxu0 %v4475_v38 }
 0x39e   : >> { %3254 = vmatmul.mubr.msk.f32.gmra.mrb[6].mxu0 %vm1462_vm8, %v4954_v9 }
 0x39f   : >> { %3256 = vmatprep.mubr.msk.f32.mxu0 %vm1462_vm8, %v4225_v33 }
 0x3a0   : >> { %3446 = vmatpush3.bf16.msra.mxu0 %v4475_v38 }
 0x3a2   : >> { %3257 = vmatmul.mubr.msk.f32.gmra.mrb[8].mxu0 %vm1462_vm8, %v4230_v56 }
 0x3a3   : >> { %3259 = vmatprep.mubr.msk.f32.mxu0 %vm1462_vm8, %v4235_v57 }
 0x3a6   : >> { %3260 = vmatmul.mubr.msk.f32.gmra.mrb[10].mxu0 %vm1462_vm8, %v4240_v48 }
 0x3a7   : >> { %3262 = vmatprep.mubr.msk.f32.mxu0 %vm1462_vm8, %v4245_v63 }
 0x3aa   : >> { %3263 = vmatmul.mubr.msk.f32.gmra.mrb[12].mxu0 %vm1462_vm8, %v4953_v18 }
 0x3ab   : >> { %3265 = vmatprep.mubr.msk.f32.mxu0 %vm1462_vm8, %v4955_v0 }
 0x3ae   : >> { %3266 = vmatmul.mubr.msk.f32.gmra.mrb[14].mxu0 %vm1462_vm8, %v4260_v62 }
 0x403   : >> { %v1868_v3 = vpop.permute.xlu0 %1867 }
 0x404   : >> { %3308 = vmatprep.subr.mxu0 %v1868_v3 }
 0x465   : >> { %v3246_v36 = vpop.f32.mrb[0].mxu0 }
 0x466   : >> { %v1577_v34 = vpop.f32.mrb[1].mxu0  ;;  %v1657_v46 = vmul.f32 %v3246_v36, %v4951_v1 }
 0x467   : >> { %v1656_v59 = vmul.f32 %v1577_v34, %v4265_v19 }
 0x469   : >> { %v3249_v51 = vpop.f32.mrb[2].mxu0  ;;  %3284 = vmatprep.mubr.msk.f32.mxu0 %vm1672_vm9, %v1656_v59 }
 0x46a   : >> { %v1659_v47 = vmul.f32 %v3249_v51, %v4280_v5  ;;  %v1587_v44 = vpop.f32.mrb[3].mxu0  ;;  %3285 = vmatmul.mubr.msk.f32.vlgmr.msra.gmra.mrb[16].mxu0 %vm1672_vm9, %v1657_v46 }
 0x46b   : >> { %v1658_v52 = vmul.f32 %v1587_v44, %v4950_v4  ;;  %3309 = vmatpush3.msra.mxu0 %v1868_v3  ;;  %3310 = vmatprep.mubr.msk.f32.mxu0 %vm1462_vm8, %v4185_v53 }
 0x46d   : >> { %v3252_v45 = vpop.f32.mrb[4].mxu0  ;;  %3287 = vmatprep.mubr.msk.f32.mxu1 %vm1672_vm9, %v1658_v52 }
 0x46e   : >> { %v1661_v39 = vmul.f32 %v3252_v45, %v4290_v6  ;;  %v1597_v37 = vpop.f32.mrb[5].mxu0  ;;  %3288 = vmatmul.mubr.msk.f32.vlgmr.msra.gmra.mrb[0].mxu1 %vm1672_vm9, %v1659_v47  ;;  %3311 = vmatmul.mubr.msk.f32.vlgmr.msra.gmra.mrb[18].mxu0 %vm1462_vm8, %v4190_v54  ;;  %v4776_v54 = vld [vmem:[#allocation3 + $0x18] sm:$0xff] (%p1445_p4) }
 0x46f   : >> { %v1660_v58 = vmul.f32 %v1597_v37, %v4285_v60  ;;  %3313 = vmatprep.mubr.msk.f32.mxu0 %vm1462_vm8, %v4195_v55  ;;  %3450 = vmatpush3.bf16.msra.mxu1 %v4441_v43  ;;  %v2224_v37 = vlaneseq }
 0x470   : >> { %3452 = vmatprep.subr.bf16.mxu1 %v4450_v41 }
 0x471   : >> { %v3255_v20 = vpop.f32.mrb[6].mxu0  ;;  %3290 = vmatprep.mubr.msk.f32.mxu1 %vm1672_vm9, %v1660_v58  ;;  %v4584_v58 = vshrl.u32 %v2224_v37, 7  ;;  %v1460_v37 = vld [vmem:[%s1459_s19] sm:$0xff] }
 0x472   : >> { %v1663_v22 = vmul.f32 %v3255_v20, %v4300_v10  ;;  %v1607_v35 = vpop.f32.mrb[7].mxu0  ;;  %3291 = vmatmul.mubr.msk.f32.gmra.mrb[2].mxu1 %vm1672_vm9, %v1661_v39  ;;  %3314 = vmatmul.mubr.msk.f32.gmra.mrb[20].mxu0 %vm1462_vm8, %v4200_v28 }
 0x473   : >> { %v1662_v50 = vmul.f32 %v1607_v35, %v4295_v61  ;;  %3316 = vmatprep.mubr.msk.f32.mxu0 %vm1462_vm8, %v4205_v32  ;;  %3454 = vmatpush3.bf16.msra.mxu1 %v4450_v41  ;;  %v2226_v20 = vsub.s32 0, %v4584_v58  ;;  %v2522_v32 = vsub.f32 (%p1445_p4), 0.0, %v4776_v54 }
 0x474   : >> { %3456 = vmatprep.subr.bf16.mxu1 %v4467_v8 }
 0x475   : >> { %v3258_v43 = vpop.f32.mrb[8].mxu0  ;;  %3293 = vmatprep.mubr.msk.f32.mxu1 %vm1672_vm9, %v1662_v50  ;;  %v2236_v50 = vsub.s32 1, %v4584_v58 }
 0x476   : >> { %v1665_v29 = vmul.f32 %v3258_v43, %v4310_v12  ;;  %v1617_v3 = vpop.f32.mrb[9].mxu0  ;;  %3294 = vmatmul.mubr.msk.f32.gmra.mrb[4].mxu1 %vm1672_vm9, %v1663_v22  ;;  %3317 = vmatmul.mubr.msk.f32.gmra.mrb[22].mxu0 %vm1462_vm8, %v4952_v21  ;;  %v4589_v22 = vld [vmem:[%s1456_s0 + $0x8] sm:$0xff] }
 0x477   : >> { %v1664_v36 = vmul.f32 %v1617_v3, %v4305_v11  ;;  %3319 = vmatprep.mubr.msk.f32.mxu0 %vm1462_vm8, %v4215_v49  ;;  %3458 = vmatpush3.bf16.msra.mxu1 %v4467_v8  ;;  %v2227_v35 = vrot.slane %v4589_v22, %v2226_v20  ;;  %v4961_v43 = vld [vmem:[#allocation9_spill] sm:$0xff]  ;;  %v4962_v3 = vld [vmem:[#allocation8_spill] sm:$0xff] }
 0x478   : >> { %3460 = vmatprep.subr.bf16.mxu1 %v4475_v38  ;;  %v4780_v49 = vld [vmem:[#allocation3 + $0x20] sm:$0xff] (%p1445_p4) }
 0x479   : >> { %v3261_v41 = vpop.f32.mrb[10].mxu0  ;;  %3296 = vmatprep.mubr.msk.f32.mxu1 %vm1672_vm9, %v1664_v36  ;;  %v2228_v36 = vmul.f32 %v2227_v35, %v4962_v3 }
 0x47a   : >> { %v1667_v34 = vmul.f32 %v3261_v41, %v4320_v2  ;;  %v1627_v59 = vpop.f32.mrb[11].mxu0  ;;  %3297 = vmatmul.mubr.msk.f32.gmra.mrb[6].mxu1 %vm1672_vm9, %v1665_v29  ;;  %3320 = vmatmul.mubr.msk.f32.gmra.mrb[24].mxu0 %vm1462_vm8, %v4954_v9  ;;  %v2229_v29 = vmul.f32 %v2227_v35, %v4961_v43  ;;  %v2237_v41 = vrot.slane %v4589_v22, %v2236_v50 }
 0x47b   : >> { %v1666_v46 = vmul.f32 %v1627_v59, %v4315_v13  ;;  %3322 = vmatprep.mubr.msk.f32.mxu0 %vm1462_vm8, %v4225_v33  ;;  %3462 = vmatpush3.bf16.msra.mxu1 %v4475_v38  ;;  %v4782_v33 = vld [vmem:[#allocation3 + $0x28] sm:$0xff] (%p1445_p4) }
 0x47c   : >> { %v2232_v59 = vmul.f32 1.442695, %v2229_v29 }
 0x47d   : >> { %v3264_v8 = vpop.f32.mrb[12].mxu0  ;;  %3299 = vmatprep.mubr.msk.f32.mxu1 %vm1672_vm9, %v1666_v46  ;;  %v2230_v46 = vmul.f32 1.442695, %v2228_v36 }
 0x47e   : >> { %v1669_v51 = vmul.f32 %v3264_v8, %v4330_v17  ;;  %v1637_v47 = vpop.f32.mrb[13].mxu0  ;;  %3300 = vmatmul.mubr.msk.f32.gmra.mrb[8].mxu1 %vm1672_vm9, %v1667_v34  ;;  %3323 = vmatmul.mubr.msk.f32.gmra.mrb[26].mxu0 %vm1462_vm8, %v4230_v56  ;;  %v2246_v34 = vsub.s32 2, %v4584_v58  ;;  %v4919_v8 = vsub.s32 3, %v4584_v58  ;;  %3628 = vpow2.f32 %v2232_v59 }
 0x47f   : >> { %v1668_v44 = vmul.f32 %v1637_v47, %v4325_v15  ;;  %3325 = vmatprep.mubr.msk.f32.mxu0 %vm1462_vm8, %v4235_v57  ;;  %3630 = vpow2.f32 %v2230_v46  ;;  %v4923_v59 = vsub.s32 5, %v4584_v58  ;;  %v4614_v46 = vmul.f32 %v1460_v37, %v4589_v22 }
 0x480   : >> { %v2247_v47 = vrot.slane %v4589_v22, %v2246_v34  ;;  %v4926_v37 = vsub.s32 6, %v4584_v58  ;;  %v2533_v57 = vmul.f32 (%p1445_p4), 1.442695, %v2522_v32 }
 0x481   : >> { %v3267_v52 = vpop.f32.mrb[14].mxu0  ;;  %3302 = vmatprep.mubr.msk.f32.mxu1 %vm1672_vm9, %v1668_v44  ;;  %v2238_v44 = vmul.f32 %v2237_v41, %v4962_v3  ;;  %v2277_v7 = vrot.slane %v4589_v22, %v4923_v59 }
 0x482   : >> { %v1671_v38 = vmul.f32 %v3267_v52, %v4340_v42  ;;  %v1647_v45 = vpop.f32.mrb[15].mxu0  ;;  %3303 = vmatmul.mubr.msk.f32.gmra.mrb[10].mxu1 %vm1672_vm9, %v1669_v51  ;;  %3326 = vmatmul.mubr.msk.f32.gmra.mrb[28].mxu0 %vm1462_vm8, %v4240_v48  ;;  %v2239_v51 = vmul.f32 %v2237_v41, %v4961_v43  ;;  %v2257_v52 = vrot.slane %v4589_v22, %v4919_v8  ;;  %v2523_v48 = vsub.f32 (%p1445_p4), 0.0, %v4780_v49 }
 0x483   : >> { %v1670_v39 = vmul.f32 %v1647_v45, %v4335_v25  ;;  %3328 = vmatprep.mubr.msk.f32.mxu0 %vm1462_vm8, %v4245_v63  ;;  %v2240_v35 = vmul.f32 1.442695, %v2238_v44  ;;  %v2248_v29 = vmul.f32 %v2247_v47, %v4962_v3  ;;  %v2278_v59 = vmul.f32 %v2277_v7, %v4962_v3 }
 0x484   : >> { %v2242_v45 = vmul.f32 1.442695, %v2239_v51  ;;  %v2259_v36 = vmul.f32 %v2257_v52, %v4961_v43  ;;  %v2524_v63 = vsub.f32 (%p1445_p4), 0.0, %v4782_v33 }
 0x485   : >> { %3305 = vmatprep.mubr.msk.f32.mxu1 %vm1672_vm9, %v1670_v39  ;;  %v2249_v39 = vmul.f32 %v2247_v47, %v4961_v43  ;;  %v2250_v8 = vmul.f32 1.442695, %v2248_v29 }
 0x486   : >> { %3306 = vmatmul.mubr.msk.f32.gmra.mrb[12].mxu1 %vm1672_vm9, %v1671_v38  ;;  %3329 = vmatmul.mubr.msk.f32.gmra.mrb[30].mxu0 %vm1462_vm8, %v4953_v18  ;;  %v4922_v38 = vsub.s32 4, %v4584_v58  ;;  %3632 = vpow2.f32 %v2242_v45  ;;  %v2262_v44 = vmul.f32 1.442695, %v2259_v36 }
 0x487   : >> { %3331 = vmatprep.mubr.msk.f32.mxu0 %vm1462_vm8, %v4955_v0  ;;  %v2252_v51 = vmul.f32 1.442695, %v2249_v39  ;;  %3634 = vpow2.f32 %v2240_v35  ;;  %v2258_v0 = vmul.f32 %v2257_v52, %v4962_v3  ;;  %v2279_v35 = vmul.f32 %v2277_v7, %v4961_v43 }
 0x488   : >> { %v2267_v41 = vrot.slane %v4589_v22, %v4922_v38  ;;  %v3629_v9 = vpop.eup %3628  ;;  %v2307_v38 = vrot.slane %v4614_v46, %v2226_v20  ;;  %v2287_v20 = vrot.slane %v4589_v22, %v4926_v37 }
 0x489   : >> { %3636 = vpow2.f32 %v2252_v51  ;;  %v3631_v14 = vpop.eup %3630  ;;  %v2260_v45 = vmul.f32 1.442695, %v2258_v0  ;;  %v2353_v29 = vmul.f32 %v3733_v40, %v3629_v9  ;;  %v2319_v40 = vrot.slane %v4614_v46, %v2246_v34 }
 0x48a   : >> { %3332 = vmatmul.mubr.msk.f32.gmra.mrb[32].mxu0 %vm1462_vm8, %v4260_v62  ;;  %v2269_v47 = vmul.f32 %v2267_v41, %v4961_v43  ;;  %3638 = vpow2.f32 %v2250_v8  ;;  %v2268_v39 = vmul.f32 %v2267_v41, %v4962_v3  ;;  %v2352_v8 = vmul.f32 %v3737_v24, %v3631_v14  ;;  %v4786_v62 = vld [vmem:[#allocation3 + $0x30] sm:$0xff] (%p1445_p4) }
 0x48b   : >> { %3640 = vpow2.f32 %v2262_v44  ;;  %v2313_v41 = vrot.slane %v4614_v46, %v2236_v50  ;;  %v2282_v7 = vmul.f32 1.442695, %v2279_v35  ;;  %v2280_v51 = vmul.f32 1.442695, %v2278_v59 }
 0x48c   : >> { %v2272_v52 = vmul.f32 1.442695, %v2269_v47  ;;  %3642 = vpow2.f32 %v2260_v45  ;;  %v2270_v44 = vmul.f32 1.442695, %v2268_v39  ;;  %v2289_v14 = vmul.f32 %v2287_v20, %v4961_v43 }
 0x48d   : >> { %v4963_v24 = vsub.s32 7, %v4584_v58  ;;  %v2288_v34 = vmul.f32 %v2287_v20, %v4962_v3 }
 0x48e   : >> { %3644 = vpow2.f32 %v2272_v52 }
 0x48f   : >> { %v2297_v50 = vrot.slane %v4589_v22, %v4963_v24  ;;  %3646 = vpow2.f32 %v2270_v44 }
 0x490   : >> { %v3633_v47 = vpop.eup %3632  ;;  %3648 = vpow2.f32 %v2282_v7 }
 0x491   : >> { %v3635_v9 = vpop.eup %3634  ;;  %3650 = vpow2.f32 %v2280_v51  ;;  %v2299_v44 = vmul.f32 %v2297_v50, %v4961_v43  ;;  %v2298_v7 = vmul.f32 %v2297_v50, %v4962_v3 }
 0x493   : >> { %v3637_v35 = vpop.eup %3636 }
 0x53d   : >> { %v3286_v36 = vpop.f32.mrb[16].mxu0 }
 0x53e   : >> { %v2309_v0 = vmul.f32 %v3286_v36, %v2307_v38  ;;  %v1787_v16 = vpop.f32.mrb[17].mxu0 }
 0x53f   : >> { %v2308_v18 = vmul.f32 %v2307_v38, %v1787_v16 }
 0x540   : >> { %v4634_v21 = vadd.f32 %v2353_v29, %v2309_v0  ;;  %v3639_v0 = vpop.eup %3638 }
 0x541   : >> { %v3289_v37 = vpop.f32.mrb[0].mxu1  ;;  %v3312_v23 = vpop.f32.mrb[18].mxu0  ;;  %v4640_v45 = vadd.f32 %v2352_v8, %v2308_v18  ;;  %v4964_v18 = vsub.s32 3, %v4584_v58 }
 0x542   : >> { %v2315_v39 = vmul.f32 %v3289_v37, %v2313_v41  ;;  %v1797_v16 = vpop.f32.mrb[1].mxu1  ;;  %v1936_v38 = vpop.f32.mrb[19].mxu0  ;;  %v2359_v52 = vmul.f32 %v3633_v47, %v4634_v21  ;;  %v2016_v26 = vmul.f32 %v3312_v23, %v4951_v1 }
 0x543   : >> { %v2314_v29 = vmul.f32 %v2313_v41, %v1797_v16  ;;  %v2015_v59 = vmul.f32 %v1936_v38, %v4265_v19  ;;  %v2358_v36 = vmul.f32 %v3635_v9, %v4640_v45  ;;  %v2325_v22 = vrot.slane %v4614_v46, %v4964_v18  ;;  %v3641_v9 = vpop.eup %3640  ;;  %v4788_v19 = vld [vmem:[#allocation3 + $0x38] sm:$0xff] (%p1445_p4) }
 0x544   : >> { %v4650_v37 = vadd.f32 %v2359_v52, %v2315_v39  ;;  %v2292_v41 = vmul.f32 1.442695, %v2289_v14  ;;  %v2290_v38 = vmul.f32 1.442695, %v2288_v34  ;;  %v3643_v14 = vpop.eup %3642  ;;  %v2302_v34 = vmul.f32 1.442695, %v2299_v44 }
 0x545   : >> { %v3292_v8 = vpop.f32.mrb[2].mxu1  ;;  %v3315_v20 = vpop.f32.mrb[20].mxu0  ;;  %3350 = vmatprep.mubr.msk.f32.mxu1 %vm1672_vm9, %v2015_v59  ;;  %v4654_v47 = vadd.f32 %v2358_v36, %v2314_v29 }
 0x546   : >> { %v2321_v24 = vmul.f32 %v3292_v8, %v2319_v40  ;;  %v1807_v23 = vpop.f32.mrb[3].mxu1  ;;  %v1946_v16 = vpop.f32.mrb[21].mxu0  ;;  %3351 = vmatmul.mubr.msk.f32.vlgmr.msra.gmra.mrb[14].mxu1 %vm1672_vm9, %v2016_v26  ;;  %v2365_v39 = vmul.f32 %v3637_v35, %v4650_v37  ;;  %v2018_v29 = vmul.f32 %v3315_v20, %v4280_v5  ;;  %v4965_v26 = vsub.s32 4, %v4584_v58 }
 0x547   : >> { %v2320_v52 = vmul.f32 %v2319_v40, %v1807_v23  ;;  %v2017_v59 = vmul.f32 %v1946_v16, %v4950_v4  ;;  %v2364_v51 = vmul.f32 %v3639_v0, %v4654_v47  ;;  %3652 = vpow2.f32 %v2292_v41  ;;  %v3645_v35 = vpop.eup %3644 }
 0x548   : >> { %v4662_v36 = vadd.f32 %v2365_v39, %v2321_v24  ;;  %v2331_v50 = vrot.slane %v4614_v46, %v4965_v26  ;;  %3654 = vpow2.f32 %v2290_v38  ;;  %v2300_v20 = vmul.f32 1.442695, %v2298_v7  ;;  %v3647_v26 = vpop.eup %3646 }
 0x549   : >> { %v3295_v18 = vpop.f32.mrb[4].mxu1  ;;  %v3318_v8 = vpop.f32.mrb[22].mxu0  ;;  %3353 = vmatprep.mubr.msk.f32.mxu1 %vm1672_vm9, %v2017_v59  ;;  %v4668_v40 = vadd.f32 %v2364_v51, %v2320_v52  ;;  %3656 = vpow2.f32 %v2302_v34  ;;  %v2525_v5 = vsub.f32 (%p1445_p4), 0.0, %v4786_v62 }
 0x54a   : >> { %v2327_v23 = vmul.f32 %v3295_v18, %v2325_v22  ;;  %v1817_v0 = vpop.f32.mrb[5].mxu1  ;;  %v1956_v16 = vpop.f32.mrb[23].mxu0  ;;  %3354 = vmatmul.mubr.msk.f32.gmra.mrb[16].mxu1 %vm1672_vm9, %v2018_v29  ;;  %v2371_v24 = vmul.f32 %v3641_v9, %v4662_v36  ;;  %v2020_v41 = vmul.f32 %v3318_v8, %v4290_v6  ;;  %3658 = vpow2.f32 %v2300_v20 }
 0x54b   : >> { %v2326_v39 = vmul.f32 %v2325_v22, %v1817_v0  ;;  %v2019_v59 = vmul.f32 %v1956_v16, %v4285_v60  ;;  %v2370_v1 = vmul.f32 %v3643_v14, %v4668_v40  ;;  %v3649_v38 = vpop.eup %3648  ;;  %v4966_v14 = vsub.s32 5, %v4584_v58 }
 0x54c   : >> { %v4675_v44 = vadd.f32 %v2371_v24, %v2327_v23  ;;  %v3651_v23 = vpop.eup %3650  ;;  %v2535_v60 = vmul.f32 (%p1445_p4), 1.442695, %v2523_v48  ;;  %v2537_v6 = vmul.f32 (%p1445_p4), 1.442695, %v2524_v63 }
 0x54d   : >> { %v3298_v52 = vpop.f32.mrb[6].mxu1  ;;  %v3321_v51 = vpop.f32.mrb[24].mxu0  ;;  %3356 = vmatprep.mubr.msk.f32.mxu1 %vm1672_vm9, %v2019_v59  ;;  %v4678_v29 = vadd.f32 %v2370_v1, %v2326_v39  ;;  %v2337_v18 = vrot.slane %v4614_v46, %v4966_v14 }
 0x54e   : >> { %v2333_v7 = vmul.f32 %v3298_v52, %v2331_v50  ;;  %v1827_v9 = vpop.f32.mrb[7].mxu1  ;;  %v1966_v22 = vpop.f32.mrb[25].mxu0  ;;  %3357 = vmatmul.mubr.msk.f32.gmra.mrb[18].mxu1 %vm1672_vm9, %v2020_v41  ;;  %v2377_v8 = vmul.f32 %v3645_v35, %v4675_v44  ;;  %v2022_v34 = vmul.f32 %v3321_v51, %v4300_v10  ;;  %v2539_v10 = vmul.f32 (%p1445_p4), 1.442695, %v2525_v5 }
 0x54f   : >> { %v2332_v0 = vmul.f32 %v2331_v50, %v1827_v9  ;;  %v2021_v16 = vmul.f32 %v1966_v22, %v4295_v61  ;;  %v2376_v1 = vmul.f32 %v3647_v26, %v4678_v29  ;;  %v4967_v50 = vsub.s32 6, %v4584_v58 }
 0x550   : >> { %v4688_v24 = vadd.f32 %v2377_v8, %v2333_v7  ;;  %v2526_v61 = vsub.f32 (%p1445_p4), 0.0, %v4788_v19 }
 0x551   : >> { %v3301_v39 = vpop.f32.mrb[8].mxu1  ;;  %v3324_v59 = vpop.f32.mrb[26].mxu0  ;;  %3359 = vmatprep.mubr.msk.f32.mxu1 %vm1672_vm9, %v2021_v16  ;;  %v4691_v41 = vadd.f32 %v2376_v1, %v2332_v0  ;;  %v2343_v35 = vrot.slane %v4614_v46, %v4967_v50 }
 0x552   : >> { %v2339_v52 = vmul.f32 %v3301_v39, %v2337_v18  ;;  %v1837_v20 = vpop.f32.mrb[9].mxu1  ;;  %v1976_v14 = vpop.f32.mrb[27].mxu0  ;;  %3360 = vmatmul.mubr.msk.f32.gmra.mrb[20].mxu1 %vm1672_vm9, %v2022_v34  ;;  %v2383_v26 = vmul.f32 %v3649_v38, %v4688_v24  ;;  %v2024_v0 = vmul.f32 %v3324_v59, %v4310_v12 }
 0x553   : >> { %v3653_v51 = vpop.eup %3652  ;;  %v2338_v7 = vmul.f32 %v2337_v18, %v1837_v20  ;;  %v2023_v9 = vmul.f32 %v1976_v14, %v4305_v11  ;;  %v2382_v22 = vmul.f32 %v3651_v23, %v4691_v41  ;;  %v4968_v18 = vsub.s32 7, %v4584_v58 }
 0x554   : >> { %v3655_v8 = vpop.eup %3654  ;;  %v4701_v16 = vadd.f32 %v2383_v26, %v2339_v52  ;;  %v2541_v11 = vmul.f32 (%p1445_p4), 1.442695, %v2526_v61 }
 0x555   : >> { %v3304_v1 = vpop.f32.mrb[10].mxu1  ;;  %v3327_v39 = vpop.f32.mrb[28].mxu0  ;;  %3362 = vmatprep.mubr.msk.f32.mxu1 %vm1672_vm9, %v2023_v9  ;;  %v4704_v34 = vadd.f32 %v2382_v22, %v2338_v7  ;;  %v2349_v23 = vrot.slane %v4614_v46, %v4968_v18 }
 0x556   : >> { %v2345_v50 = vmul.f32 %v3304_v1, %v2343_v35  ;;  %v1847_v3 = vpop.f32.mrb[11].mxu1  ;;  %v1986_v38 = vpop.f32.mrb[29].mxu0  ;;  %3363 = vmatmul.mubr.msk.f32.gmra.mrb[22].mxu1 %vm1672_vm9, %v2024_v0  ;;  %v2389_v20 = vmul.f32 %v3653_v51, %v4701_v16  ;;  %v2026_v7 = vmul.f32 %v3327_v39, %v4320_v2 }
 0x557   : >> { %v3657_v59 = vpop.eup %3656  ;;  %v2344_v52 = vmul.f32 %v2343_v35, %v1847_v3  ;;  %v2025_v14 = vmul.f32 %v1986_v38, %v4315_v13  ;;  %v2388_v26 = vmul.f32 %v3655_v8, %v4704_v34 }
 0x558   : >> { %v3659_v9 = vpop.eup %3658  ;;  %v4714_v22 = vadd.f32 %v2389_v20, %v2345_v50 }
 0x559   : >> { %v3307_v1 = vpop.f32.mrb[12].mxu1  ;;  %v3330_v4 = vpop.f32.mrb[30].mxu0  ;;  %3365 = vmatprep.mubr.msk.f32.mxu1 %vm1672_vm9, %v2025_v14  ;;  %v4717_v58 = vadd.f32 %v2388_v26, %v2344_v52 }
 0x55a   : >> { %v2351_v46 = vmul.f32 %v3307_v1, %v2349_v23  ;;  %v1857_v0 = vpop.f32.mrb[13].mxu1  ;;  %v1996_v51 = vpop.f32.mrb[31].mxu0  ;;  %3366 = vmatmul.mubr.msk.f32.gmra.mrb[24].mxu1 %vm1672_vm9, %v2026_v7  ;;  %v2395_v3 = vmul.f32 %v3657_v59, %v4714_v22  ;;  %v2028_v50 = vmul.f32 %v3330_v4, %v4330_v17  ;;  %v3746_v59 = vmov 0.0|0.0  }
 0x55b   : >> { %v2350_v35 = vmul.f32 %v2349_v23, %v1857_v0  ;;  %v2027_v8 = vmul.f32 %v1996_v51, %v4325_v15  ;;  %v2394_v39 = vmul.f32 %v3659_v9, %v4717_v58  ;;  %3463 = vmatprep.subr.bf16.mxu0 %v3746_v59  ;;  %v3748_v4 = vmov 0.0  }
 0x55c   : >> { %v4724_v38 = vadd.f32 %v2395_v3, %v2351_v46   ;;  %3406 = vmatprep.mubr.msk.f32.mxu0 %vm3747_vm10, %v3748_v4 }
 0x55d   : >> { %v3333_v18 = vpop.f32.mrb[32].mxu0  ;;  %3368 = vmatprep.mubr.msk.f32.mxu1 %vm1672_vm9, %v2027_v8  ;;  %v4727_v20 = vadd.f32 %v2394_v39, %v2350_v35  }
 0x55e   : >> { %v2006_v52 = vpop.f32.mrb[33].mxu0  ;;  %3369 = vmatmul.mubr.msk.f32.gmra.mrb[26].mxu1 %vm1672_vm9, %v2028_v50  ;;  %v2030_v23 = vmul.f32 %v3333_v18, %v4340_v42 }
 0x55f   : >> { %v2029_v14 = vmul.f32 %v2006_v52, %v4335_v25 }
 0x561   : >> { %3371 = vmatprep.mubr.msk.f32.mxu1 %vm1672_vm9, %v2029_v14 }
 0x562   : >> { %3372 = vmatmul.mubr.msk.f32.gmra.mrb[28].mxu1 %vm1672_vm9, %v2030_v23 }
 0x619   : >> { %v3352_v26 = vpop.f32.mrb[14].mxu1 }
 0x61a   : >> { %v2357_v9 = vmul.f32 %v3352_v26, %v4634_v21  ;;  %v2145_v7 = vpop.f32.mrb[15].mxu1 }
 0x61b   : >> { %v2356_v1 = vmul.f32 %v4640_v45, %v2145_v7 }
 0x61d   : >> { %v3464_v46 = vpack.c.bf16 %v2357_v9, %v2356_v1  ;;  %v3355_v0 = vpop.f32.mrb[16].mxu1 }
 0x61e   : >> { %v2363_v51 = vmul.f32 %v3355_v0, %v4650_v37  ;;  %v2155_v3 = vpop.f32.mrb[17].mxu1 }
 0x61f   : >> { %v2362_v35 = vmul.f32 %v4654_v47, %v2155_v3  ;;  %3465 = vmatpush3.bf16.msra.mxu0 %v3464_v46 }
 0x620   : >> { %3466 = vmatprep.subr.bf16.mxu0 %v3746_v59 }
 0x621   : >> { %v3467_v8 = vpack.c.bf16 %v2363_v51, %v2362_v35  ;;  %v3358_v39 = vpop.f32.mrb[18].mxu1 }
 0x622   : >> { %v2369_v50 = vmul.f32 %v3358_v39, %v4662_v36  ;;  %v2165_v18 = vpop.f32.mrb[19].mxu1 }
 0x623   : >> { %v2368_v52 = vmul.f32 %v4668_v40, %v2165_v18  ;;  %3468 = vmatpush3.bf16.msra.mxu0 %v3467_v8  ;;  %v3661_v18 = vld [vmem:[%s4908_s10 + $0x8] sm:$0xff] (%p1445_p4)  }
 0x624   : >> { %3469 = vmatprep.subr.bf16.mxu0 %v3746_v59 }
 0x625   : >> { %v3470_v21 = vpack.c.bf16 %v2369_v50, %v2368_v52  ;;  %v3361_v45 = vpop.f32.mrb[20].mxu1  ;;  %v4969_v50 = vld [vmem:[#allocation21_spill] sm:$0xff]  ;;  %v4768_v52 = vld [vmem:[#allocation3] sm:$0xff] (%p1445_p4) }
 0x626   : >> { %v2375_v14 = vmul.f32 %v3361_v45, %v4675_v44  ;;  %v2175_v23 = vpop.f32.mrb[21].mxu1  ;;  %v4774_v45 = vld [vmem:[#allocation3 + $0x10] sm:$0xff] (%p1445_p4) }
 0x627   : >> { %v2374_v37 = vmul.f32 %v4678_v29, %v2175_v23  ;;  %3471 = vmatpush3.bf16.msra.mxu0 %v3470_v21  ;;  %v2521_v28 = vsub.f32 (%p1445_p4), 0.0, %v4774_v45 }
 0x628   : >> { %3472 = vmatprep.subr.bf16.mxu0 %v3746_v59 }
 0x629   : >> { %v3473_v47 = vpack.c.bf16 %v2375_v14, %v2374_v37  ;;  %v3364_v4 = vpop.f32.mrb[22].mxu1  ;;  %v2531_v56 = vmul.f32 (%p1445_p4), 1.442695, %v2521_v28  ;;  %v2481_v14 = vld [vmem:[#allocation4 + $0x8] sm:$0xff] (%p1445_p4) }
 0x62a   : >> { %v2381_v26 = vmul.f32 %v3364_v4, %v4688_v24  ;;  %v2185_v9 = vpop.f32.mrb[23].mxu1  ;;  %v2495_v4 = vmul.f32 (%p1445_p4), %v3097_v30, %v2480_v27 }
 0x62b   : >> { %v2380_v36 = vmul.f32 %v4691_v41, %v2185_v9  ;;  %3474 = vmatpush3.bf16.msra.mxu0 %v3473_v47 }
 0x62c   : >> { %3475 = vmatprep.subr.bf16.mxu0 %v3746_v59 }
 0x62d   : >> { %v3476_v40 = vpack.c.bf16 %v2381_v26, %v2380_v36  ;;  %v3367_v7 = vpop.f32.mrb[24].mxu1  ;;  %v2482_v26 = vld [vmem:[#allocation4 + $0x10] sm:$0xff] (%p1445_p4) }
 0x62e   : >> { %v2387_v1 = vmul.f32 %v3367_v7, %v4701_v16  ;;  %v2195_v46 = vpop.f32.mrb[25].mxu1  ;;  %v2496_v7 = vmul.f32 (%p1445_p4), %v3097_v30, %v2481_v14 }
 0x62f   : >> { %v2386_v44 = vmul.f32 %v4704_v34, %v2195_v46  ;;  %3477 = vmatpush3.bf16.msra.mxu0 %v3476_v40  ;;  %v4970_v40 = vmov %v4724_v38 }
 0x630   : >> { %3478 = vmatprep.subr.bf16.mxu0 %v3746_v59 }
 0x631   : >> { %v3479_v29 = vpack.c.bf16 %v2387_v1, %v2386_v44  ;;  %v3370_v0 = vpop.f32.mrb[26].mxu1  ;;  %v2483_v1 = vld [vmem:[#allocation4 + $0x18] sm:$0xff] (%p1445_p4) }
 0x632   : >> { %v2393_v51 = vmul.f32 %v3370_v0, %v4714_v22  ;;  %v2205_v24 = vpop.f32.mrb[27].mxu1  ;;  %v2497_v0 = vmul.f32 (%p1445_p4), %v3097_v30, %v2482_v26  ;;  %v2592_v26 = vstv (%p1445_p4), %s2583_s26 }
 0x633   : >> { %v2392_v3 = vmul.f32 %v4717_v58, %v2205_v24  ;;  %3480 = vmatpush3.bf16.msra.mxu0 %v3479_v29  ;;  %v4971_v24 = vmov %v4727_v20 }
 0x634   : >> { %3481 = vmatprep.subr.bf16.mxu0 %v3746_v59 }
 0x635   : >> { %v3482_v41 = vpack.c.bf16 %v2393_v51, %v2392_v3  ;;  %v3373_v35 = vpop.f32.mrb[28].mxu1  ;;  %v2484_v51 = vld [vmem:[#allocation4 + $0x20] sm:$0xff] (%p1445_p4) }
 0x636   : >> { %v2399_v8 = vmul.f32 %v3373_v35, %v4724_v38  ;;  %v2215_v16 = vpop.f32.mrb[29].mxu1  ;;  %v4770_v38 = vld [vmem:[#allocation3 + $0x8] sm:$0xff] (%p1445_p4) }
 0x637   : >> { %v2398_v39 = vmul.f32 %v4727_v20, %v2215_v16  ;;  %3483 = vmatpush3.bf16.msra.mxu0 %v3482_v41  ;;  %v2519_v20 = vsub.f32 (%p1445_p4), 0.0, %v4768_v52  ;;  %v2520_v21 = vsub.f32 (%p1445_p4), 0.0, %v4770_v38  ;;  %v2498_v41 = vmul.f32 (%p1445_p4), %v3097_v30, %v2483_v1  ;;  %v2485_v35 = vld [vmem:[#allocation4 + $0x28] sm:$0xff] (%p1445_p4) }
 0x638   : >> { %3484 = vmatprep.subr.bf16.mxu0 %v3746_v59  ;;  %v3660_v59 = vld [vmem:[%s4908_s10] sm:$0xff] (%p1445_p4)  }
 0x639   : >> { %v3485_v34 = vpack.c.bf16 %v2399_v8, %v2398_v39  ;;  %v2527_v53 = vmul.f32 (%p1445_p4), 1.442695, %v2519_v20  ;;  %v2529_v55 = vmul.f32 (%p1445_p4), 1.442695, %v2520_v21 }
 0x63b   : >> { %3486 = vmatpush3.bf16.msra.mxu0 %v3485_v34  ;;  %3663 = vpow2.f32 (%p1445_p4), %v2527_v53  ;;  %v2486_v34 = vld [vmem:[#allocation4 + $0x30] sm:$0xff] (%p1445_p4)  ;;  %v2500_v53 = vmul.f32 (%p1445_p4), %v3097_v30, %v2485_v35  ;;  %v2588_v35 = vld [vmem:[#allocation2 + $0x20] sm:$0xff] (%p1445_p4) }
 0x63c   : > { %3409 = vmatprep.subr.bf16.mxu0 (%p1445_p4), %v3660_v59  ;;  %3665 = vpow2.f32 (%p1445_p4), %v2529_v55 }
 0x63d   : > { %3667 = vpow2.f32 (%p1445_p4), %v2531_v56 }
 0x63e   : >> { %3407 = vmatmul.mubr.f32.vlgmr.msra.gmra.mrb[34].mxu0 %v4969_v50  ;;  %3669 = vpow2.f32 (%p1445_p4), %v2533_v57  ;;  %v2501_v57 = vmul.f32 (%p1445_p4), %v3097_v30, %v2486_v34  ;;  %v2589_v34 = vld [vmem:[#allocation2 + $0x28] sm:$0xff] (%p1445_p4) }
 0x63f   : > { %3410 = vmatpush3.bf16.msra.mxu0 (%p1445_p4), %v3660_v59  ;;  %3671 = vpow2.f32 (%p1445_p4), %v2535_v60  ;;  %v2487_v59 = vld [vmem:[#allocation4 + $0x38] sm:$0xff] (%p1445_p4) }
 0x640   : > { %3411 = vmatprep.subr.bf16.mxu0 (%p1445_p4), %v3661_v18  ;;  %3673 = vpow2.f32 (%p1445_p4), %v2537_v6  ;;  %v2502_v6 = vmul.f32 (%p1445_p4), %v3097_v30, %v2487_v59 }
 0x641   : > { %3675 = vpow2.f32 (%p1445_p4), %v2539_v10 }
 0x642   : > { %3677 = vpow2.f32 (%p1445_p4), %v2541_v11 }
 0x643   : > { %3412 = vmatpush3.bf16.msra.mxu0 (%p1445_p4), %v3661_v18 }
 0x645   : > { %v3664_v12 = vpop.eup (%p1445_p4), %3663 }
 0x646   : > { %v3666_v13 = vpop.eup (%p1445_p4), %3665  ;;  %v2543_v2 = vadd.f32 (%p1445_p4), 1.0, %v3664_v12 }
 0x647   : > { %v2544_v15 = vadd.f32 (%p1445_p4), 1.0, %v3666_v13  ;;  %v3668_v17 = vpop.eup (%p1445_p4), %3667 }
 0x648   : > { %3679 = vrcp.f32 (%p1445_p4), %v2543_v2  ;;  %v3670_v25 = vpop.eup (%p1445_p4), %3669  ;;  %v2545_v42 = vadd.f32 (%p1445_p4), 1.0, %v3668_v17 }
 0x649   : > { %3681 = vrcp.f32 (%p1445_p4), %v2544_v15  ;;  %v2546_v31 = vadd.f32 (%p1445_p4), 1.0, %v3670_v25  ;;  %v3672_v43 = vpop.eup (%p1445_p4), %3671 }
 0x64a   : > { %3683 = vrcp.f32 (%p1445_p4), %v2545_v42  ;;  %v3674_v23 = vpop.eup (%p1445_p4), %3673  ;;  %v2547_v37 = vadd.f32 (%p1445_p4), 1.0, %v3672_v43 }
 0x64b   : > { %3685 = vrcp.f32 (%p1445_p4), %v2546_v31  ;;  %v3676_v47 = vpop.eup (%p1445_p4), %3675  ;;  %v2548_v9 = vadd.f32 (%p1445_p4), 1.0, %v3674_v23 }
 0x64c   : > { %v3678_v36 = vpop.eup (%p1445_p4), %3677  ;;  %3687 = vrcp.f32 (%p1445_p4), %v2547_v37  ;;  %v2549_v46 = vadd.f32 (%p1445_p4), 1.0, %v3676_v47 }
 0x64d   : > { %3689 = vrcp.f32 (%p1445_p4), %v2548_v9  ;;  %v2550_v29 = vadd.f32 (%p1445_p4), 1.0, %v3678_v36  ;;  %v2584_v9 = vld [vmem:[#allocation2] sm:$0xff] (%p1445_p4)  ;;  %v2587_v36 = vld [vmem:[#allocation2 + $0x18] sm:$0xff] (%p1445_p4) }
 0x64e   : > { %3691 = vrcp.f32 (%p1445_p4), %v2549_v46  ;;  %v2596_v1 = vmul.f32 (%p1445_p4), %v2592_v26, %v2587_v36 }
 0x64f   : > { %3693 = vrcp.f32 (%p1445_p4), %v2550_v29 }
 0x652   : > { %v3680_v8 = vpop.eup (%p1445_p4), %3679 }
 0x653   : > { %v3682_v50 = vpop.eup (%p1445_p4), %3681 }
 0x654   : > { %v2560_v18 = vmul.f32 (%p1445_p4), %v3682_v50, %v4770_v38  ;;  %v3684_v55 = vpop.eup (%p1445_p4), %3683  ;;  %v2597_v50 = vmul.f32 (%p1445_p4), %v2592_v26, %v2588_v35  ;;  %v3662_v35 = vld [vmem:[%s4909_s11] sm:$0xff] (%p1445_p4)  }
 0x655   : > { %v3686_v48 = vpop.eup (%p1445_p4), %3685  ;;  %v2561_v5 = vmul.f32 (%p1445_p4), %v3684_v55, %v4774_v45  ;;  %3421 = vmatprep.subr.bf16.mxu1 (%p1445_p4), %v3662_v35 }
 0x656   : > { %v3688_v11 = vpop.eup (%p1445_p4), %3687  ;;  %3422 = vmatpush3.bf16.msra.mxu1 (%p1445_p4), %v3662_v35  ;;  %v3106_v35 = vld [vmem:[%s4910_s12] ss:$0 sm:$0xff] (%p1445_p4) }
 0x657   : > { %v3690_v2 = vpop.eup (%p1445_p4), %3689  ;;  %v2563_v17 = vmul.f32 (%p1445_p4), %v3688_v11, %v4780_v49 }
 0x658   : > { %v3692_v42 = vpop.eup (%p1445_p4), %3691  ;;  %v2564_v45 = vmul.f32 (%p1445_p4), %v3690_v2, %v4782_v33  ;;  %v2586_v33 = vld [vmem:[#allocation2 + $0x10] sm:$0xff] (%p1445_p4) }
 0x659   : > { %v2565_v43 = vmul.f32 (%p1445_p4), %v3692_v42, %v4786_v62  ;;  %v2585_v62 = vld [vmem:[#allocation2 + $0x8] sm:$0xff] (%p1445_p4) }
 0x65a   : > { %v2594_v46 = vmul.f32 (%p1445_p4), %v2592_v26, %v2585_v62 }
 0x70c   : > { %1447 = sbr.rel (!%p1445_p4) target bundleno = 905 (0x389), region = 132 }
 0x711   : >> { %v2466_v22 = vpop.f32.mrb[34].mxu0 }
 0x712   : >> { %2471 = vst.msk [vmem:[%s2470_s1] sm:$0xff] %vm851_vm5, %v2466_v22  ;;  %v3408_v58 = vpop.f32.mrb[35].mxu0  ;;  %v2559_v22 = vmul.f32 (%p1445_p4), %v3680_v8, %v4768_v52  ;;  %v2562_v52 = vmul.f32 (%p1445_p4), %v3686_v48, %v4776_v54 }
 0x713   : > { %v2499_v58 = vmul.f32 %v3097_v30, %v2484_v51  ;;  %v3694_v30 = vpop.eup %3693 }
 0x714   : > { %v2566_v23 = vmul.f32 %v3694_v30, %v4788_v19 }
 0x719   : > { %v2472_v40 = vld [vmem:[#allocation6] sm:$0xff]  ;;  %v2473_v44 = vld [vmem:[#allocation6 + $0x8] sm:$0xff]  ;;  %v2474_v3 = vld [vmem:[#allocation6 + $0x10] sm:$0xff] }
 0x71a   : > { %v2503_v24 = vadd.f32 %v2495_v4, %v2472_v40  ;;  %v2504_v16 = vadd.f32 %v2496_v7, %v2473_v44  ;;  %v2475_v39 = vld [vmem:[#allocation6 + $0x18] sm:$0xff]  ;;  %v2505_v20 = vadd.f32 %v2497_v0, %v2474_v3  ;;  %v2476_v21 = vld [vmem:[#allocation6 + $0x20] sm:$0xff]  ;;  %v2477_v56 = vld [vmem:[#allocation6 + $0x28] sm:$0xff]  ;;  %v2595_v40 = vmul.f32 %v2592_v26, %v2586_v33 }
 0x71b   : > { %v2506_v32 = vadd.f32 %v2498_v41, %v2475_v39  ;;  %v2478_v60 = vld [vmem:[#allocation6 + $0x30] sm:$0xff]  ;;  %v2507_v61 = vadd.f32 %v2499_v58, %v2476_v21  ;;  %v2479_v10 = vld [vmem:[#allocation6 + $0x38] sm:$0xff]  ;;  %v2508_v13 = vadd.f32 %v2500_v53, %v2477_v56  ;;  %v2593_v7 = vmul.f32 %v2592_v26, %v2584_v9 }
 0x71c   : > { %v2567_v28 = vmul.f32 %v2559_v22, %v2503_v24  ;;  %v2568_v63 = vmul.f32 %v2560_v18, %v2504_v16  ;;  %v2569_v12 = vmul.f32 %v2561_v5, %v2505_v20  ;;  %v2509_v25 = vadd.f32 %v2501_v57, %v2478_v60  ;;  %v2590_v39 = vld [vmem:[#allocation2 + $0x30] sm:$0xff]  ;;  %v2591_v58 = vld [vmem:[#allocation2 + $0x38] sm:$0xff] }
 0x71d   : > { %v2570_v15 = vmul.f32 %v2562_v52, %v2506_v32  ;;  %v2510_v27 = vadd.f32 %v2502_v6, %v2479_v10  ;;  %v2571_v54 = vmul.f32 %v2563_v17, %v2507_v61  ;;  %v2572_v14 = vmul.f32 %v2564_v45, %v2508_v13 }
 0x71e   : > { %v2575_v38 = vpack.c.bf16 %v2568_v63, %v2567_v28  ;;  %v2573_v37 = vmul.f32 %v2565_v43, %v2509_v25  ;;  %v2599_v59 = vmul.f32 %v2592_v26, %v2590_v39  ;;  %v2598_v21 = vmul.f32 %v2592_v26, %v2589_v34 }
 0x71f   : > { %v2576_v31 = vpack.c.bf16 %v2570_v15, %v2569_v12  ;;  %v2577_v47 = vpack.c.bf16 %v2572_v14, %v2571_v54  ;;  %v2574_v49 = vmul.f32 %v2566_v23, %v2510_v27  ;;  %v2600_v28 = vmul.f32 %v2592_v26, %v2591_v58 }
 0x720   : > { %3413 = vmatprep.mubr.msk.bf16.mxu0 %vm851_vm5, %v2575_v38 }
 0x721   : > { %3414 = vmatmul.mubr.msk.bf16.vlgmr.msra.gmra.mrb[0].mxu0 %vm851_vm5, %v2576_v31  ;;  %v2578_v4 = vpack.c.bf16 %v2574_v49, %v2573_v37 }
 0x722   : > { %3417 = vmatprep.mubr.msk.bf16.mxu0 %vm851_vm5, %v2577_v47 }
 0x729   : > { %3418 = vmatmul.mubr.msk.bf16.gmra.mrb[4].mxu0 %vm851_vm5, %v2578_v4 }
 0x7f4   : > { %v3415_v19 = vpop.f32.mrb[0].mxu0 }
 0x7f5   : > { %v2668_v44 = vadd.f32 %v3415_v19, %v2595_v40  ;;  %v2659_v29 = vpop.f32.mrb[1].mxu0 }
 0x7f6   : > { %v2660_v0 = vadd.f32 %v2659_v29, %v2593_v7  ;;  %v3416_v51 = vpop.f32.mrb[2].mxu0 }
 0x7f7   : > { %v2671_v24 = vadd.f32 %v3416_v51, %v2596_v1  ;;  %v2662_v3 = vpop.f32.mrb[3].mxu0  ;;  %v2698_v41 = vsel %vm588_vm0, %v2668_v44, 0.0 }
 0x7f8   : > { %v2663_v8 = vadd.f32 %v2662_v3, %v2594_v46  ;;  %2699 = vadd.xlane.f32.xlu1 %v2698_v41  ;;  %v2692_v16 = vsel %vm588_vm0, %v2660_v0, 0.0 }
 0x7f9   : > { %2693 = vadd.xlane.f32.xlu0 %v2692_v16  ;;  %v2701_v22 = vsel %vm588_vm0, %v2671_v24, 0.0 }
 0x7fa   : > { %v2695_v20 = vsel %vm588_vm0, %v2663_v8, 0.0 }
 0x7fc   : > { %2702 = vadd.xlane.f32.xlu1 %v2701_v22  ;;  %v3419_v18 = vpop.f32.mrb[4].mxu0 }
 0x7fd   : > { %v2675_v53 = vpop.f32.mrb[5].mxu0  ;;  %2696 = vadd.xlane.f32.xlu0 %v2695_v20  ;;  %v2684_v57 = vadd.f32 %v3419_v18, %v2599_v59 }
 0x7fe   : > { %v2676_v55 = vadd.f32 %v2675_v53, %v2597_v50  ;;  %v3420_v32 = vpop.f32.mrb[6].mxu0 }
 0x7ff   : > { %v2678_v56 = vpop.f32.mrb[7].mxu0  ;;  %v2687_v5 = vadd.f32 %v3420_v32, %v2600_v28  ;;  %v2710_v6 = vsel %vm588_vm0, %v2684_v57, 0.0 }
 0x800   : > { %v2679_v48 = vadd.f32 %v2678_v56, %v2598_v21  ;;  %v2704_v63 = vsel %vm588_vm0, %v2676_v55, 0.0 }
 0x801   : > { %2705 = vadd.xlane.f32.xlu0 %v2704_v63  ;;  %v2713_v52 = vsel %vm588_vm0, %v2687_v5, 0.0 }
 0x802   : > { %v2707_v60 = vsel %vm588_vm0, %v2679_v48, 0.0 }
 0x803   : > { %2708 = vadd.xlane.f32.xlu1 %v2707_v60 }
 0x805   : > { %2711 = vadd.xlane.f32.xlu0 %v2710_v6 }
 0x807   : > { %2714 = vadd.xlane.f32.xlu1 %v2713_v52 }
 0x885   : > { %v2700_v61 = vpop.xlane.xlu1 %2699 }
 0x886   : > { %v2718_v10 = vmul.f32 0.0625, %v2700_v61  ;;  %v2694_v11 = vpop.xlane.xlu0 %2693 }
 0x887   : > { %v2716_v38 = vmul.f32 0.0625, %v2694_v11  ;;  %v3104_v11 = vld [vmem:[%s4972_s17] ss:$0 sm:$0xff] }
 0x888   : > { %v4815_v12 = vsub.f32 %v2668_v44, %v2718_v10 }
 0x889   : > { %v4817_v13 = vsub.f32 %v2660_v0, %v2716_v38  ;;  %v2703_v2 = vpop.xlane.xlu1 %2702 }
 0x88a   : > { %v2719_v15 = vmul.f32 0.0625, %v2703_v2  ;;  %v2697_v17 = vpop.xlane.xlu0 %2696  ;;  %v2734_v31 = vmul.f32 %v4815_v12, %v4815_v12 }
 0x88b   : > { %v2717_v25 = vmul.f32 0.0625, %v2697_v17  ;;  %v2732_v42 = vmul.f32 %v4817_v13, %v4817_v13 }
 0x88c   : > { %v4821_v45 = vsub.f32 %v2671_v24, %v2719_v15  ;;  %v2746_v4 = vsel %vm588_vm0, %v2734_v31, 0.0 }
 0x88d   : > { %v4823_v27 = vsub.f32 %v2663_v8, %v2717_v25  ;;  %v2740_v30 = vsel %vm588_vm0, %v2732_v42, 0.0  ;;  %v3105_v42 = vld [vmem:[%s4973_s20] ss:$0 sm:$0xff] }
 0x88e   : > { %2741 = vadd.xlane.f32.xlu0 %v2740_v30  ;;  %v2706_v54 = vpop.xlane.xlu0 %2705  ;;  %v2735_v37 = vmul.f32 %v4821_v45, %v4821_v45 }
 0x88f   : > { %v2720_v43 = vmul.f32 0.0625, %v2706_v54  ;;  %v2733_v14 = vmul.f32 %v4823_v27, %v4823_v27 }
 0x890   : > { %v2709_v23 = vpop.xlane.xlu1 %2708  ;;  %v2749_v7 = vsel %vm588_vm0, %v2735_v37, 0.0 }
 0x891   : > { %v4832_v47 = vsub.f32 %v2676_v55, %v2720_v43  ;;  %v2721_v49 = vmul.f32 0.0625, %v2709_v23  ;;  %v2743_v33 = vsel %vm588_vm0, %v2733_v14, 0.0 }
 0x892   : > { %2747 = vadd.xlane.f32.xlu0 %v2746_v4  ;;  %2744 = vadd.xlane.f32.xlu1 %v2743_v33  ;;  %v2712_v26 = vpop.xlane.xlu0 %2711 }
 0x893   : > { %v4836_v9 = vsub.f32 %v2679_v48, %v2721_v49  ;;  %v2722_v36 = vmul.f32 0.0625, %v2712_v26  ;;  %v2736_v40 = vmul.f32 %v4832_v47, %v4832_v47 }
 0x894   : > { %v2715_v62 = vpop.xlane.xlu1 %2714 }
 0x895   : > { %v4841_v1 = vsub.f32 %v2684_v57, %v2722_v36  ;;  %v2723_v19 = vmul.f32 0.0625, %v2715_v62  ;;  %v2752_v46 = vsel %vm588_vm0, %v2736_v40, 0.0  ;;  %v2737_v44 = vmul.f32 %v4836_v9, %v4836_v9 }
 0x896   : > { %2750 = vadd.xlane.f32.xlu1 %v2749_v7  ;;  %2753 = vadd.xlane.f32.xlu0 %v2752_v46 }
 0x897   : > { %v4846_v29 = vsub.f32 %v2687_v5, %v2723_v19  ;;  %v2738_v0 = vmul.f32 %v4841_v1, %v4841_v1  ;;  %v2755_v51 = vsel %vm588_vm0, %v2737_v44, 0.0 }
 0x899   : > { %v2758_v24 = vsel %vm588_vm0, %v2738_v0, 0.0  ;;  %v2739_v3 = vmul.f32 %v4846_v29, %v4846_v29 }
 0x89a   : > { %2756 = vadd.xlane.f32.xlu1 %v2755_v51  ;;  %2759 = vadd.xlane.f32.xlu0 %v2758_v24 }
 0x89b   : > { %v2761_v41 = vsel %vm588_vm0, %v2739_v3, 0.0 }
 0x89e   : > { %2762 = vadd.xlane.f32.xlu1 %v2761_v41 }
 0x91b   : > { %v2742_v8 = vpop.xlane.xlu0 %2741 }
 0x91c   : > { %v2764_v16 = vmul.f32 0.0625, %v2742_v8 }
 0x91e   : > { %v2772_v39 = vadd.f32 1e-05, %v2764_v16 }
 0x91f   : > { %v2745_v34 = vpop.xlane.xlu1 %2744  ;;  %v2748_v50 = vpop.xlane.xlu0 %2747 }
 0x920   : > { %3695 = vrsqrt.f32 %v2772_v39  ;;  %v2765_v22 = vmul.f32 0.0625, %v2745_v34  ;;  %v2766_v58 = vmul.f32 0.0625, %v2748_v50 }
 0x922   : > { %v2773_v59 = vadd.f32 1e-05, %v2765_v22  ;;  %v2774_v18 = vadd.f32 1e-05, %v2766_v58 }
 0x923   : > { %v2751_v20 = vpop.xlane.xlu1 %2750  ;;  %v2754_v21 = vpop.xlane.xlu0 %2753 }
 0x924   : > { %3697 = vrsqrt.f32 %v2773_v59  ;;  %v2767_v53 = vmul.f32 0.0625, %v2751_v20  ;;  %v2768_v55 = vmul.f32 0.0625, %v2754_v21 }
 0x925   : > { %3699 = vrsqrt.f32 %v2774_v18 }
 0x926   : > { %v2775_v28 = vadd.f32 1e-05, %v2767_v53  ;;  %v2776_v32 = vadd.f32 1e-05, %v2768_v55 }
 0x927   : > { %v2757_v56 = vpop.xlane.xlu1 %2756  ;;  %v2760_v57 = vpop.xlane.xlu0 %2759 }
 0x928   : > { %3701 = vrsqrt.f32 %v2775_v28  ;;  %v2769_v48 = vmul.f32 0.0625, %v2757_v56  ;;  %v2770_v63 = vmul.f32 0.0625, %v2760_v57 }
 0x929   : > { %3703 = vrsqrt.f32 %v2776_v32 }
 0x92a   : > { %v3696_v5 = vpop.eup %3695  ;;  %v2777_v60 = vadd.f32 1e-05, %v2769_v48  ;;  %v2778_v6 = vadd.f32 1e-05, %v2770_v63 }
 0x92b   : > { %v2763_v52 = vpop.xlane.xlu1 %2762  ;;  %v2788_v61 = vmul.f32 %v3696_v5, %v4817_v13 }
 0x92c   : > { %3705 = vrsqrt.f32 %v2777_v60  ;;  %v2771_v10 = vmul.f32 0.0625, %v2763_v52 }
 0x92d   : > { %3707 = vrsqrt.f32 %v2778_v6  ;;  %v2802_v25 = vmul.f32 %v3104_v11, %v2788_v61 }
 0x92e   : > { %v3698_v38 = vpop.eup %3697  ;;  %v2779_v2 = vadd.f32 1e-05, %v2771_v10 }
 0x92f   : > { %v3700_v15 = vpop.eup %3699  ;;  %v2789_v17 = vmul.f32 %v3698_v38, %v4823_v27  ;;  %v2816_v43 = vadd.f32 %v3105_v42, %v2802_v25 }
 0x930   : > { %3709 = vrsqrt.f32 %v2779_v2  ;;  %v2790_v13 = vmul.f32 %v3700_v15, %v4815_v12 }
 0x931   : > { %v2803_v30 = vmul.f32 %v3104_v11, %v2789_v17 }
 0x932   : > { %v3702_v31 = vpop.eup %3701  ;;  %v2804_v37 = vmul.f32 %v3104_v11, %v2790_v13 }
 0x933   : > { %v3704_v54 = vpop.eup %3703  ;;  %v2817_v14 = vadd.f32 %v3105_v42, %v2803_v30  ;;  %v2791_v23 = vmul.f32 %v3702_v31, %v4821_v45 }
 0x934   : > { %v2792_v49 = vmul.f32 %v3704_v54, %v4832_v47  ;;  %v2818_v36 = vadd.f32 %v3105_v42, %v2804_v37 }
 0x935   : > { %v2824_v4 = vpack.c.bf16 %v2817_v14, %v2816_v43  ;;  %v2805_v27 = vmul.f32 %v3104_v11, %v2791_v23 }
 0x936   : > { %v3706_v33 = vpop.eup %3705  ;;  %v2806_v62 = vmul.f32 %v3104_v11, %v2792_v49 }
 0x937   : > { %v3708_v26 = vpop.eup %3707  ;;  %3423 = vmatprep.mubr.msk.bf16.mxu1 %vm588_vm0, %v2824_v4  ;;  %v2819_v40 = vadd.f32 %v3105_v42, %v2805_v27  ;;  %v2793_v12 = vmul.f32 %v3706_v33, %v4836_v9 }
 0x938   : > { %v2794_v7 = vmul.f32 %v3708_v26, %v4841_v1  ;;  %v2820_v45 = vadd.f32 %v3105_v42, %v2806_v62 }
 0x939   : > { %v2825_v19 = vpack.c.bf16 %v2819_v40, %v2818_v36  ;;  %v2807_v46 = vmul.f32 %v3104_v11, %v2793_v12 }
 0x93a   : > { %v3710_v44 = vpop.eup %3709  ;;  %v2808_v51 = vmul.f32 %v3104_v11, %v2794_v7 }
 0x93b   : > { %3424 = vmatmul.mubr.msk.bf16.vlgmr.msra.gmra.mrb[0].mxu1 %vm588_vm0, %v2825_v19  ;;  %v2821_v47 = vadd.f32 %v3105_v42, %v2807_v46  ;;  %v2795_v0 = vmul.f32 %v3710_v44, %v4846_v29 }
 0x93c   : > { %v2822_v9 = vadd.f32 %v3105_v42, %v2808_v51 }
 0x93d   : > { %v2826_v24 = vpack.c.bf16 %v2821_v47, %v2820_v45  ;;  %v2809_v3 = vmul.f32 %v3104_v11, %v2795_v0 }
 0x93f   : > { %3427 = vmatprep.mubr.msk.bf16.mxu1 %vm588_vm0, %v2826_v24  ;;  %v2823_v1 = vadd.f32 %v3105_v42, %v2809_v3 }
 0x941   : > { %v2827_v41 = vpack.c.bf16 %v2823_v1, %v2822_v9 }
 0x943   : > { %3428 = vmatmul.mubr.msk.bf16.gmra.mrb[4].mxu1 %vm588_vm0, %v2827_v41 }
 0xa0e   : > { %v3425_v8 = vpop.f32.mrb[0].mxu1 }
 0xa0f   : > { %v2898_v16 = vadd.f32 %v3425_v8, %v3106_v35  ;;  %v2889_v29 = vpop.f32.mrb[1].mxu1 }
 0xa10   : > { %v2890_v39 = vadd.f32 %v3106_v35, %v2889_v29  ;;  %v3426_v34 = vpop.f32.mrb[2].mxu1 }
 0xa11   : > { %2922 = vst.msk [vmem:[%s3861_s2 + $0x10] sm:$0xff] %vm588_vm0, %v2898_v16  ;;  %v2901_v50 = vadd.f32 %v3426_v34, %v3106_v35  ;;  %v2892_v22 = vpop.f32.mrb[3].mxu1 }
 0xa12   : > { %2920 = vst.msk [vmem:[%s3861_s2] sm:$0xff] %vm588_vm0, %v2890_v39  ;;  %v2893_v58 = vadd.f32 %v3106_v35, %v2892_v22 }
 0xa13   : > { %2923 = vst.msk [vmem:[%s3861_s2 + $0x18] sm:$0xff] %vm588_vm0, %v2901_v50 }
 0xa14   : > { %2921 = vst.msk [vmem:[%s3861_s2 + $0x8] sm:$0xff] %vm588_vm0, %v2893_v58 }
 0xa16   : > { %v3429_v59 = vpop.f32.mrb[4].mxu1 }
 0xa17   : > { %v2914_v18 = vadd.f32 %v3429_v59, %v3106_v35  ;;  %v2905_v20 = vpop.f32.mrb[5].mxu1 }
 0xa18   : > { %v2906_v21 = vadd.f32 %v3106_v35, %v2905_v20  ;;  %v3430_v53 = vpop.f32.mrb[6].mxu1 }
 0xa19   : > { %2926 = vst.msk [vmem:[%s3861_s2 + $0x30] sm:$0xff] %vm588_vm0, %v2914_v18  ;;  %v2917_v55 = vadd.f32 %v3430_v53, %v3106_v35  ;;  %v2908_v28 = vpop.f32.mrb[7].mxu1 }
 0xa1a   : > { %2924 = vst.msk [vmem:[%s3861_s2 + $0x20] sm:$0xff] %vm588_vm0, %v2906_v21  ;;  %v2909_v32 = vadd.f32 %v3106_v35, %v2908_v28 }
 0xa1b   : > { %2927 = vst.msk [vmem:[%s3861_s2 + $0x38] sm:$0xff] %vm588_vm0, %v2917_v55 }
 0xa1c   : > { %2925 = vst.msk [vmem:[%s3861_s2 + $0x28] sm:$0xff] %vm588_vm0, %v2909_v32 }
 0xa1d PF: > { %s29_s29 = sadd.s32 1, %s3729_s29  }
 0xa1e   : > { %p26_p5 = scmp.ge.s32.totalorder %s29_s29, 4  }
 0xa20   :  { %28 = sbr.rel (!%p26_p5) target bundleno = 5 (0x5), region = 143 }

</bundles_post_ra>
